<compile_context>
chip_gen: v5e
topology: v5e:2x2
jax: 0.10.0
libtpu: 0.0.40
codegen_flags: <defaults>
</compile_context>

<pallas_src>
import functools

import jax
import jax.numpy as jnp
from jax.experimental import pallas as pl
from jax.experimental.pallas import tpu as pltpu

_EPS = 1e-5


def _round_up(x, m):
    return ((x + m - 1) // m) * m


# ----------------------- tiled matmul w/ fused epilogue ----------------------

def _mm_kernel(a_ref, b_ref, *rest, apply_bn_relu, add_residual):
    """acc[i,j] += A[i,k] @ B[k,j]; optional epilogue at the last K step."""
    idx = 0
    if apply_bn_relu:
        s_ref, bi_ref = rest[idx], rest[idx + 1]
        idx += 2
    if add_residual:
        r_ref = rest[idx]
        idx += 1
    o_ref, acc_ref = rest[idx], rest[idx + 1]

    k = pl.program_id(2)

    @pl.when(k == 0)
    def _():
        acc_ref[...] = jnp.zeros_like(acc_ref)

    acc_ref[...] += jnp.dot(a_ref[...], b_ref[...],
                            preferred_element_type=jnp.float32)

    @pl.when(k == pl.num_programs(2) - 1)
    def _():
        y = acc_ref[...]
        if apply_bn_relu:                     # relu(y * scale + bias)
            y = jnp.maximum(y * s_ref[...] + bi_ref[...], 0.0)
        if add_residual:                      # y + residual
            y = y + r_ref[...]
        o_ref[...] = y.astype(o_ref.dtype)


def matmul_fused(a, b, *, scale=None, bias=None, residual=None,
                 tm=256, tn=256, tk=512):
    """(M,K)@(K,N) on the MXU, bf16 inputs, fp32 accumulation, fused epilogue.

    scale/bias: optional per-output-channel (N,) fp32 -> relu(y*scale+bias).
    residual  : optional (M,N) fp32 -> y + residual.
    Inputs are zero-padded to tile multiples; tiles shrink to the padded array
    when the problem is small so only one tile set lives in VMEM per buffer.
    """
    M, K = a.shape
    K2, N = b.shape
    assert K == K2, (a.shape, b.shape)
    apply_bn_relu = scale is not None
    add_residual = residual is not None

    tm = min(tm, _round_up(M, 8))
    tn = min(tn, _round_up(N, 128))
    tk = min(tk, _round_up(K, 128))
    Mp, Np, Kp = _round_up(M, tm), _round_up(N, tn), _round_up(K, tk)

    a_p = jnp.pad(a.astype(jnp.bfloat16), ((0, Mp - M), (0, Kp - K)))
    b_p = jnp.pad(b.astype(jnp.bfloat16), ((0, Kp - K), (0, Np - N)))

    inputs = [a_p, b_p]
    in_specs = [
        pl.BlockSpec((tm, tk), lambda i, j, k: (i, k)),
        pl.BlockSpec((tk, tn), lambda i, j, k: (k, j)),
    ]
    bytes_accessed = Mp * Kp * 2 + Kp * Np * 2 + Mp * Np * 4
    if apply_bn_relu:
        s_p = jnp.pad(scale.reshape(1, N).astype(jnp.float32),
                      ((0, 0), (0, Np - N)))
        bi_p = jnp.pad(bias.reshape(1, N).astype(jnp.float32),
                       ((0, 0), (0, Np - N)))
        inputs += [s_p, bi_p]
        in_specs += [pl.BlockSpec((1, tn), lambda i, j, k: (0, j)),
                     pl.BlockSpec((1, tn), lambda i, j, k: (0, j))]
    if add_residual:
        r_p = jnp.pad(residual.astype(jnp.float32),
                      ((0, Mp - M), (0, Np - N)))
        inputs += [r_p]
        in_specs += [pl.BlockSpec((tm, tn), lambda i, j, k: (i, j))]
        bytes_accessed += Mp * Np * 4

    kernel = functools.partial(_mm_kernel,
                               apply_bn_relu=apply_bn_relu,
                               add_residual=add_residual)

    out = pl.pallas_call(
        kernel,
        out_shape=jax.ShapeDtypeStruct((Mp, Np), jnp.float32),
        grid=(Mp // tm, Np // tn, Kp // tk),
        in_specs=in_specs,
        out_specs=pl.BlockSpec((tm, tn), lambda i, j, k: (i, j)),
        scratch_shapes=[pltpu.VMEM((tm, tn), jnp.float32)],
        compiler_params=pltpu.CompilerParams(
            dimension_semantics=("parallel", "parallel", "arbitrary")),
        cost_estimate=pl.CostEstimate(
            flops=2 * Mp * Np * Kp,
            transcendentals=0,
            bytes_accessed=bytes_accessed),
    )(*inputs)
    return out[:M, :N]


# ----------------------------- tiled BN + ReLU -------------------------------

def _bn_relu_kernel(x_ref, s_ref, b_ref, o_ref):
    o_ref[...] = jnp.maximum(x_ref[...] * s_ref[...] + b_ref[...], 0.0)


def pallas_bn_relu(x2d, scale, bias, *, tm=1024):
    """relu(x * scale + bias) with per-channel scale/bias, x2d: (M, C)."""
    M, C = x2d.shape
    tm = min(tm, _round_up(M, 8))
    Mp = _round_up(M, tm)
    x_p = jnp.pad(x2d.astype(jnp.float32), ((0, Mp - M), (0, 0)))
    s = scale.reshape(1, C).astype(jnp.float32)
    b = bias.reshape(1, C).astype(jnp.float32)
    out = pl.pallas_call(
        _bn_relu_kernel,
        out_shape=jax.ShapeDtypeStruct((Mp, C), jnp.float32),
        grid=(Mp // tm,),
        in_specs=[
            pl.BlockSpec((tm, C), lambda i: (i, 0)),
            pl.BlockSpec((1, C), lambda i: (0, 0)),
            pl.BlockSpec((1, C), lambda i: (0, 0)),
        ],
        out_specs=pl.BlockSpec((tm, C), lambda i: (i, 0)),
        compiler_params=pltpu.CompilerParams(
            dimension_semantics=("parallel",)),
    )(x_p, s, b)
    return out[:M]


# -------------------------------- im2col glue --------------------------------

def _im2col3x3(x_nhwc, stride):
    """3x3 / pad=1 patches -> (N*Ho*Wo, 9*C); tap order (dy, dx, cin)."""
    N, H, W, C = x_nhwc.shape
    xp = jnp.pad(x_nhwc, ((0, 0), (1, 1), (1, 1), (0, 0)))
    Ho = (H + 2 - 3) // stride + 1
    Wo = (W + 2 - 3) // stride + 1
    cols = []
    for dy in range(3):
        for dx in range(3):
            cols.append(xp[:,
                           dy:dy + stride * (Ho - 1) + 1:stride,
                           dx:dx + stride * (Wo - 1) + 1:stride, :])
    pat = jnp.concatenate(cols, axis=-1)               # (N, Ho, Wo, 9*C)
    return pat.reshape(N * Ho * Wo, 9 * C)
# TODO(synk): stream the 9 conv taps through the matmul's K grid axis via the
# BlockSpec index_map instead of materializing the 9x im2col slab in HBM.


# ------------------------------- BasicBlock ----------------------------------

def pack_block_params(p):
    """Fold eval-mode BN into scale/bias and pre-pack conv weights (once)."""
    s1 = p["bn1_gamma"] / jnp.sqrt(p["bn1_var"] + _EPS)
    b1 = p["bn1_beta"] - p["bn1_mean"] * s1
    s2 = p["bn2_gamma"] / jnp.sqrt(p["bn2_var"] + _EPS)
    b2 = p["bn2_beta"] - p["bn2_mean"] * s2
    w1p = jnp.transpose(p["w1"], (2, 3, 1, 0)).reshape(-1, p["w1"].shape[0])
    w2p = jnp.transpose(p["w2"], (2, 3, 1, 0)).reshape(-1, p["w2"].shape[0])
    packed = {
        "s1": s1, "b1": b1, "s2": s2, "b2": b2,
        "w1_packed": w1p.astype(jnp.bfloat16),
        "w2_packed": w2p.astype(jnp.bfloat16),
    }
    if p["w_sc"] is not None:
        cout, cin = p["w_sc"].shape[:2]
        packed["w_sc_packed"] = p["w_sc"].reshape(cout, cin).T.astype(jnp.bfloat16)
    return packed


def basic_block_forward(x_nhwc, p, stride):
    N, H, W, C = x_nhwc.shape
    has_shortcut = "w_sc_packed" in p
    if (not has_shortcut) and stride != 1:
        raise ValueError(
            "in_planes == out_planes with stride > 1 has no valid residual "
            "path (mirrors the PyTorch module's latent constraint)")

    # o = relu(bn1(x))  (eval-mode BN folded into per-channel scale/bias)
    o2d = pallas_bn_relu(x_nhwc.reshape(N * H * W, C), p["s1"], p["b1"])
    o = o2d.reshape(N, H, W, C)

    Ho = (H + 2 - 3) // stride + 1
    Wo = (W + 2 - 3) // stride + 1
    Cout = p["w1_packed"].shape[1]

    # Residual branch.
    if has_shortcut:
        xs = o[:, ::stride, ::stride, :]                      # 1x1 conv, stride
        residual2d = matmul_fused(xs.reshape(-1, C), p["w_sc_packed"])
    else:
        residual2d = x_nhwc.reshape(N * H * W, C)

    # conv1 (3x3, stride) with bn2 + relu fused into the matmul epilogue.
    a1 = _im2col3x3(o, stride)
    h1 = matmul_fused(a1, p["w1_packed"], scale=p["s2"], bias=p["b2"])
    h1 = h1.reshape(N, Ho, Wo, Cout)

    # dropRate == 0.0 -> F.dropout is a no-op.
    # conv2 (3x3, stride 1) with the residual add fused into the epilogue.
    a2 = _im2col3x3(h1, 1)
    out = matmul_fused(a2, p["w2_packed"], residual=residual2d)
    return out.reshape(N, Ho, Wo, Cout)


def network_block_forward(x_nchw, packed_params, *, stride):
    x = jnp.transpose(x_nchw, (0, 2, 3, 1))          # NCHW -> NHWC
    for i, p in enumerate(packed_params):
        x = basic_block_forward(x, p, stride if i == 0 else 1)
    return jnp.transpose(x, (0, 3, 1, 2))            # NHWC -> NCHW


# ----------------------------- parameter init --------------------------------

def init_network_block_params(key, nb_layers, in_planes, out_planes):
    """Deterministic synthetic parameters matching the nn.Module shapes."""
    blocks = []
    for i in range(nb_layers):
        cin = in_planes if i == 0 else out_planes
        key, k0, k1, k2, k3, k4, k5, k6 = jax.random.split(key, 8)
        equal = cin == out_planes
        p = {
            "w1": 0.1 * jax.random.normal(k0, (out_planes, cin, 3, 3), jnp.float32),
            "w2": 0.1 * jax.random.normal(k1, (out_planes, out_planes, 3, 3), jnp.float32),
            "bn1_gamma": 1.0 + 0.1 * jax.random.normal(k2, (cin,), jnp.float32),
            "bn1_beta": 0.1 * jax.random.normal(k3, (cin,), jnp.float32),
            "bn2_gamma": 1.0 + 0.1 * jax.random.normal(k4, (out_planes,), jnp.float32),
            "bn2_beta": 0.1 * jax.random.normal(k5, (out_planes,), jnp.float32),
            # PyTorch default running stats (eval-mode BN).
            "bn1_mean": jnp.zeros((cin,), jnp.float32),
            "bn1_var": jnp.ones((cin,), jnp.float32),
            "bn2_mean": jnp.zeros((out_planes,), jnp.float32),
            "bn2_var": jnp.ones((out_planes,), jnp.float32),
            "w_sc": None if equal
            else 0.1 * jax.random.normal(k6, (out_planes, cin, 1, 1), jnp.float32),
        }
        blocks.append(p)
    return blocks


# ------------------------- pure-JAX fp32 reference ---------------------------

def _ref_conv(x_nhwc, w_oihw, stride, pad):
    return jax.lax.conv_general_dilated(
        x_nhwc.astype(jnp.float32),
        jnp.transpose(w_oihw, (2, 3, 1, 0)).astype(jnp.float32),
        window_strides=(stride, stride), padding=pad,
        dimension_numbers=("NHWC", "HWIO", "NHWC"))


def _ref_basic_block(x, p, stride):
    s1 = p["bn1_gamma"] / jnp.sqrt(p["bn1_var"] + _EPS)
    b1 = p["bn1_beta"] - p["bn1_mean"] * s1
    s2 = p["bn2_gamma"] / jnp.sqrt(p["bn2_var"] + _EPS)
    b2 = p["bn2_beta"] - p["bn2_mean"] * s2
    o = jnp.maximum(x * s1 + b1, 0.0)
    residual = x if p["w_sc"] is None else _ref_conv(o, p["w_sc"], stride, "VALID")
    h = _ref_conv(o, p["w1"], stride, ((1, 1), (1, 1)))
    h = jnp.maximum(h * s2 + b2, 0.0)
    h = _ref_conv(h, p["w2"], 1, ((1, 1), (1, 1)))
    return residual + h


def _ref_network_block(x_nchw, raw_params, stride):
    x = jnp.transpose(x_nchw, (0, 2, 3, 1))
    for i, p in enumerate(raw_params):
        x = _ref_basic_block(x, p, stride if i == 0 else 1)
    return jnp.transpose(x, (0, 3, 1, 2))


# TODO(synk): training-mode BatchNorm (batch statistics) and dropout with
# dropRate > 0 are not implemented; this reproduces eval-mode forward with
# dropRate=0.0 (the module default).

if __name__ == "__main__":
    # NetworkBlock(nb_layers=2, in_planes=4, out_planes=8, block=BasicBlock,
    #              stride=2, dropRate=0.0), eval mode.
    N, Cin, H, W = 2, 4, 16, 16
    Cout, nb_layers, stride = 8, 2, 2

    kx, kp = jax.random.split(jax.random.PRNGKey(0))
    x = jax.random.normal(kx, (N, Cin, H, W), jnp.float32)
    raw_params = init_network_block_params(kp, nb_layers, Cin, Cout)
    packed_params = [pack_block_params(p) for p in raw_params]   # pack once

    fwd = jax.jit(functools.partial(network_block_forward, stride=stride))
    y = jax.block_until_ready(fwd(x, packed_params))

    assert y.shape == (N, Cout, H // stride, W // stride), y.shape
    assert bool(jnp.isfinite(y).all())

    # Pure-JAX fp32 reference; bf16 MXU inputs => loose tolerance.
    y_ref = _ref_network_block(x, raw_params, stride)
    max_err = float(jnp.max(jnp.abs(y - y_ref)))
    assert max_err < 1e-1, f"max abs err vs reference: {max_err}"

    print("KERNEL_OK")
</pallas_src>

<mosaic_0001>
module attributes {stable_mosaic.version = 11 : i64} {
  func.func @_bn_relu_kernel(%arg0: i32, %arg1: memref<512x4xf32, #tpu.memory_space<vmem>>, %arg2: memref<1x4xf32, #tpu.memory_space<vmem>>, %arg3: memref<1x4xf32, #tpu.memory_space<vmem>>, %arg4: memref<512x4xf32, #tpu.memory_space<vmem>>) attributes {dimension_semantics = [#tpu.dimension_semantics<parallel>], iteration_bounds = array<i64: 1>, scalar_prefetch = 0 : i64, scratch_operands = 0 : i64, tpu.core_type = #tpu.core_type<tc>, window_params = [{transform_indices = @transform_0, window_bounds = array<i64: 512, 4>}, {pipeline_mode = #tpu.pipeline_mode<synchronous>, transform_indices = @transform_1, window_bounds = array<i64: 1, 4>}, {pipeline_mode = #tpu.pipeline_mode<synchronous>, transform_indices = @transform_2, window_bounds = array<i64: 1, 4>}, {transform_indices = @transform_3, window_bounds = array<i64: 512, 4>}]} {
    %c0 = arith.constant 0 : index
    %c0_0 = arith.constant 0 : index
    %0 = vector.load %arg1[%c0, %c0_0] : memref<512x4xf32, #tpu.memory_space<vmem>>, vector<512x4xf32>
    %c0_1 = arith.constant 0 : index
    %c0_2 = arith.constant 0 : index
    %1 = vector.load %arg2[%c0_1, %c0_2] : memref<1x4xf32, #tpu.memory_space<vmem>>, vector<1x4xf32>
    %2 = vector.broadcast %1 : vector<1x4xf32> to vector<512x4xf32>
    %3 = arith.mulf %0, %2 : vector<512x4xf32>
    %c0_3 = arith.constant 0 : index
    %c0_4 = arith.constant 0 : index
    %4 = vector.load %arg3[%c0_3, %c0_4] : memref<1x4xf32, #tpu.memory_space<vmem>>, vector<1x4xf32>
    %5 = vector.broadcast %4 : vector<1x4xf32> to vector<512x4xf32>
    %6 = arith.addf %3, %5 : vector<512x4xf32>
    %cst = arith.constant 0.000000e+00 : f32
    %7 = vector.broadcast %cst : f32 to vector<512x4xf32>
    %8 = arith.maximumf %6, %7 : vector<512x4xf32>
    %c0_5 = arith.constant 0 : index
    %c0_6 = arith.constant 0 : index
    %9 = vector.load %arg4[%c0_5, %c0_6] : memref<512x4xf32, #tpu.memory_space<vmem>>, vector<512x4xf32>
    tpu.vector_store %arg4[%c0_5, %c0_6], %8 {strides = array<i32>} : memref<512x4xf32, #tpu.memory_space<vmem>>, vector<512x4xf32>,
    return
  }
  func.func @transform_0(%arg0: i32) -> (i32, i32) {
    %c0_i32 = arith.constant 0 : i32
    %c0_i32_0 = arith.constant 0 : i32
    return %arg0, %c0_i32 : i32, i32
  }
  func.func @transform_1(%arg0: i32) -> (i32, i32) {
    %c0_i32 = arith.constant 0 : i32
    %c0_i32_0 = arith.constant 0 : i32
    %c0_i32_1 = arith.constant 0 : i32
    return %c0_i32, %c0_i32_0 : i32, i32
  }
  func.func @transform_2(%arg0: i32) -> (i32, i32) {
    %c0_i32 = arith.constant 0 : i32
    %c0_i32_0 = arith.constant 0 : i32
    %c0_i32_1 = arith.constant 0 : i32
    return %c0_i32, %c0_i32_0 : i32, i32
  }
  func.func @transform_3(%arg0: i32) -> (i32, i32) {
    %c0_i32 = arith.constant 0 : i32
    %c0_i32_0 = arith.constant 0 : i32
    return %arg0, %c0_i32 : i32, i32
  }
}

module attributes {stable_mosaic.version = 11 : i64} {
  func.func @_mm_kernel(%arg0: i32, %arg1: i32, %arg2: i32, %arg3: memref<128x128xbf16, #tpu.memory_space<vmem>>, %arg4: memref<128x128xbf16, #tpu.memory_space<vmem>>, %arg5: memref<128x128xf32, #tpu.memory_space<vmem>>, %arg6: memref<128x128xf32, #tpu.memory_space<vmem>>) attributes {dimension_semantics = [#tpu.dimension_semantics<parallel>, #tpu.dimension_semantics<parallel>, #tpu.dimension_semantics<arbitrary>], iteration_bounds = array<i64: 1, 1, 1>, scalar_prefetch = 0 : i64, scratch_operands = 1 : i64, tpu.core_type = #tpu.core_type<tc>, window_params = [{transform_indices = @transform_0, window_bounds = array<i64: 128, 128>}, {transform_indices = @transform_1, window_bounds = array<i64: 128, 128>}, {transform_indices = @transform_2, window_bounds = array<i64: 128, 128>}]} {
    %c0_i32 = arith.constant 0 : i32
    %0 = arith.cmpi eq, %arg2, %c0_i32 : i32
    %1 = arith.extui %0 : i1 to i32
    %c0_i32_0 = arith.constant 0 : i32
    %2 = arith.cmpi ne, %1, %c0_i32_0 : i32
    scf.if %2 {
      %cst_10 = arith.constant 0.000000e+00 : f32
      %12 = vector.broadcast %cst_10 : f32 to vector<128x128xf32>
      %c0_11 = arith.constant 0 : index
      %c0_12 = arith.constant 0 : index
      %13 = vector.load %arg6[%c0_11, %c0_12] : memref<128x128xf32, #tpu.memory_space<vmem>>, vector<128x128xf32>
      tpu.vector_store %arg6[%c0_11, %c0_12], %12 {strides = array<i32>} : memref<128x128xf32, #tpu.memory_space<vmem>>, vector<128x128xf32>,
    } else {
    }
    %c0 = arith.constant 0 : index
    %c0_1 = arith.constant 0 : index
    %3 = vector.load %arg6[%c0, %c0_1] : memref<128x128xf32, #tpu.memory_space<vmem>>, vector<128x128xf32>
    %c0_2 = arith.constant 0 : index
    %c0_3 = arith.constant 0 : index
    %4 = vector.load %arg3[%c0_2, %c0_3] : memref<128x128xbf16, #tpu.memory_space<vmem>>, vector<128x128xbf16>
    %c0_4 = arith.constant 0 : index
    %c0_5 = arith.constant 0 : index
    %5 = vector.load %arg4[%c0_4, %c0_5] : memref<128x128xbf16, #tpu.memory_space<vmem>>, vector<128x128xbf16>
    %cst = arith.constant dense<0.000000e+00> : vector<128x128xf32>
    %6 = tpu.matmul %4, %5, %cst {dimension_numbers = #tpu.dot_dimension_numbers<[1], [0], [0], [1], [0, 0, 1, 1], [], []>} : vector<128x128xbf16>, vector<128x128xbf16>, vector<128x128xf32> -> vector<128x128xf32>
    %7 = arith.addf %3, %6 : vector<128x128xf32>
    %c0_6 = arith.constant 0 : index
    %c0_7 = arith.constant 0 : index
    %8 = vector.load %arg6[%c0_6, %c0_7] : memref<128x128xf32, #tpu.memory_space<vmem>>, vector<128x128xf32>
    tpu.vector_store %arg6[%c0_6, %c0_7], %7 {strides = array<i32>} : memref<128x128xf32, #tpu.memory_space<vmem>>, vector<128x128xf32>,
    %c0_i32_8 = arith.constant 0 : i32
    %9 = arith.cmpi eq, %arg2, %c0_i32_8 : i32
    %10 = arith.extui %9 : i1 to i32
    %c0_i32_9 = arith.constant 0 : i32
    %11 = arith.cmpi ne, %10, %c0_i32_9 : i32
    scf.if %11 {
      %c0_10 = arith.constant 0 : index
      %c0_11 = arith.constant 0 : index
      %12 = vector.load %arg6[%c0_10, %c0_11] : memref<128x128xf32, #tpu.memory_space<vmem>>, vector<128x128xf32>
      %c0_12 = arith.constant 0 : index
      %c0_13 = arith.constant 0 : index
      %13 = vector.load %arg5[%c0_12, %c0_13] : memref<128x128xf32, #tpu.memory_space<vmem>>, vector<128x128xf32>
      tpu.vector_store %arg5[%c0_12, %c0_13], %12 {strides = array<i32>} : memref<128x128xf32, #tpu.memory_space<vmem>>, vector<128x128xf32>,
    } else {
    }
    return
  }
  func.func @transform_0(%arg0: i32, %arg1: i32, %arg2: i32) -> (i32, i32) {
    %c0_i32 = arith.constant 0 : i32
    return %arg0, %arg2 : i32, i32
  }
  func.func @transform_1(%arg0: i32, %arg1: i32, %arg2: i32) -> (i32, i32) {
    %c0_i32 = arith.constant 0 : i32
    return %arg2, %arg1 : i32, i32
  }
  func.func @transform_2(%arg0: i32, %arg1: i32, %arg2: i32) -> (i32, i32) {
    %c0_i32 = arith.constant 0 : i32
    return %arg0, %arg1 : i32, i32
  }
}

module attributes {stable_mosaic.version = 11 : i64} {
  func.func @_mm_kernel(%arg0: i32, %arg1: i32, %arg2: i32, %arg3: memref<128x128xbf16, #tpu.memory_space<vmem>>, %arg4: memref<128x128xbf16, #tpu.memory_space<vmem>>, %arg5: memref<1x128xf32, #tpu.memory_space<vmem>>, %arg6: memref<1x128xf32, #tpu.memory_space<vmem>>, %arg7: memref<128x128xf32, #tpu.memory_space<vmem>>, %arg8: memref<128x128xf32, #tpu.memory_space<vmem>>) attributes {dimension_semantics = [#tpu.dimension_semantics<parallel>, #tpu.dimension_semantics<parallel>, #tpu.dimension_semantics<arbitrary>], iteration_bounds = array<i64: 1, 1, 1>, scalar_prefetch = 0 : i64, scratch_operands = 1 : i64, tpu.core_type = #tpu.core_type<tc>, window_params = [{transform_indices = @transform_0, window_bounds = array<i64: 128, 128>}, {transform_indices = @transform_1, window_bounds = array<i64: 128, 128>}, {transform_indices = @transform_2, window_bounds = array<i64: 1, 128>}, {transform_indices = @transform_3, window_bounds = array<i64: 1, 128>}, {transform_indices = @transform_4, window_bounds = array<i64: 128, 128>}]} {
    %c0_i32 = arith.constant 0 : i32
    %0 = arith.cmpi eq, %arg2, %c0_i32 : i32
    %1 = arith.extui %0 : i1 to i32
    %c0_i32_0 = arith.constant 0 : i32
    %2 = arith.cmpi ne, %1, %c0_i32_0 : i32
    scf.if %2 {
      %cst_10 = arith.constant 0.000000e+00 : f32
      %12 = vector.broadcast %cst_10 : f32 to vector<128x128xf32>
      %c0_11 = arith.constant 0 : index
      %c0_12 = arith.constant 0 : index
      %13 = vector.load %arg8[%c0_11, %c0_12] : memref<128x128xf32, #tpu.memory_space<vmem>>, vector<128x128xf32>
      tpu.vector_store %arg8[%c0_11, %c0_12], %12 {strides = array<i32>} : memref<128x128xf32, #tpu.memory_space<vmem>>, vector<128x128xf32>,
    } else {
    }
    %c0 = arith.constant 0 : index
    %c0_1 = arith.constant 0 : index
    %3 = vector.load %arg8[%c0, %c0_1] : memref<128x128xf32, #tpu.memory_space<vmem>>, vector<128x128xf32>
    %c0_2 = arith.constant 0 : index
    %c0_3 = arith.constant 0 : index
    %4 = vector.load %arg3[%c0_2, %c0_3] : memref<128x128xbf16, #tpu.memory_space<vmem>>, vector<128x128xbf16>
    %c0_4 = arith.constant 0 : index
    %c0_5 = arith.constant 0 : index
    %5 = vector.load %arg4[%c0_4, %c0_5] : memref<128x128xbf16, #tpu.memory_space<vmem>>, vector<128x128xbf16>
    %cst = arith.constant dense<0.000000e+00> : vector<128x128xf32>
    %6 = tpu.matmul %4, %5, %cst {dimension_numbers = #tpu.dot_dimension_numbers<[1], [0], [0], [1], [0, 0, 1, 1], [], []>} : vector<128x128xbf16>, vector<128x128xbf16>, vector<128x128xf32> -> vector<128x128xf32>
    %7 = arith.addf %3, %6 : vector<128x128xf32>
    %c0_6 = arith.constant 0 : index
    %c0_7 = arith.constant 0 : index
    %8 = vector.load %arg8[%c0_6, %c0_7] : memref<128x128xf32, #tpu.memory_space<vmem>>, vector<128x128xf32>
    tpu.vector_store %arg8[%c0_6, %c0_7], %7 {strides = array<i32>} : memref<128x128xf32, #tpu.memory_space<vmem>>, vector<128x128xf32>,
    %c0_i32_8 = arith.constant 0 : i32
    %9 = arith.cmpi eq, %arg2, %c0_i32_8 : i32
    %10 = arith.extui %9 : i1 to i32
    %c0_i32_9 = arith.constant 0 : i32
    %11 = arith.cmpi ne, %10, %c0_i32_9 : i32
    scf.if %11 {
      %c0_10 = arith.constant 0 : index
      %c0_11 = arith.constant 0 : index
      %12 = vector.load %arg8[%c0_10, %c0_11] : memref<128x128xf32, #tpu.memory_space<vmem>>, vector<128x128xf32>
      %c0_12 = arith.constant 0 : index
      %c0_13 = arith.constant 0 : index
      %13 = vector.load %arg5[%c0_12, %c0_13] : memref<1x128xf32, #tpu.memory_space<vmem>>, vector<1x128xf32>
      %14 = vector.broadcast %13 : vector<1x128xf32> to vector<128x128xf32>
      %15 = arith.mulf %12, %14 : vector<128x128xf32>
      %c0_14 = arith.constant 0 : index
      %c0_15 = arith.constant 0 : index
      %16 = vector.load %arg6[%c0_14, %c0_15] : memref<1x128xf32, #tpu.memory_space<vmem>>, vector<1x128xf32>
      %17 = vector.broadcast %16 : vector<1x128xf32> to vector<128x128xf32>
      %18 = arith.addf %15, %17 : vector<128x128xf32>
      %cst_16 = arith.constant 0.000000e+00 : f32
      %19 = vector.broadcast %cst_16 : f32 to vector<128x128xf32>
      %20 = arith.maximumf %18, %19 : vector<128x128xf32>
      %c0_17 = arith.constant 0 : index
      %c0_18 = arith.constant 0 : index
      %21 = vector.load %arg7[%c0_17, %c0_18] : memref<128x128xf32, #tpu.memory_space<vmem>>, vector<128x128xf32>
      tpu.vector_store %arg7[%c0_17, %c0_18], %20 {strides = array<i32>} : memref<128x128xf32, #tpu.memory_space<vmem>>, vector<128x128xf32>,
    } else {
    }
    return
  }
  func.func @transform_0(%arg0: i32, %arg1: i32, %arg2: i32) -> (i32, i32) {
    %c0_i32 = arith.constant 0 : i32
    return %arg0, %arg2 : i32, i32
  }
  func.func @transform_1(%arg0: i32, %arg1: i32, %arg2: i32) -> (i32, i32) {
    %c0_i32 = arith.constant 0 : i32
    return %arg2, %arg1 : i32, i32
  }
  func.func @transform_2(%arg0: i32, %arg1: i32, %arg2: i32) -> (i32, i32) {
    %c0_i32 = arith.constant 0 : i32
    %c0_i32_0 = arith.constant 0 : i32
    return %c0_i32, %arg1 : i32, i32
  }
  func.func @transform_3(%arg0: i32, %arg1: i32, %arg2: i32) -> (i32, i32) {
    %c0_i32 = arith.constant 0 : i32
    %c0_i32_0 = arith.constant 0 : i32
    return %c0_i32, %arg1 : i32, i32
  }
  func.func @transform_4(%arg0: i32, %arg1: i32, %arg2: i32) -> (i32, i32) {
    %c0_i32 = arith.constant 0 : i32
    return %arg0, %arg1 : i32, i32
  }
}

module attributes {stable_mosaic.version = 11 : i64} {
  func.func @_mm_kernel(%arg0: i32, %arg1: i32, %arg2: i32, %arg3: memref<128x128xbf16, #tpu.memory_space<vmem>>, %arg4: memref<128x128xbf16, #tpu.memory_space<vmem>>, %arg5: memref<128x128xf32, #tpu.memory_space<vmem>>, %arg6: memref<128x128xf32, #tpu.memory_space<vmem>>, %arg7: memref<128x128xf32, #tpu.memory_space<vmem>>) attributes {dimension_semantics = [#tpu.dimension_semantics<parallel>, #tpu.dimension_semantics<parallel>, #tpu.dimension_semantics<arbitrary>], iteration_bounds = array<i64: 1, 1, 1>, scalar_prefetch = 0 : i64, scratch_operands = 1 : i64, tpu.core_type = #tpu.core_type<tc>, window_params = [{transform_indices = @transform_0, window_bounds = array<i64: 128, 128>}, {transform_indices = @transform_1, window_bounds = array<i64: 128, 128>}, {transform_indices = @transform_2, window_bounds = array<i64: 128, 128>}, {transform_indices = @transform_3, window_bounds = array<i64: 128, 128>}]} {
    %c0_i32 = arith.constant 0 : i32
    %0 = arith.cmpi eq, %arg2, %c0_i32 : i32
    %1 = arith.extui %0 : i1 to i32
    %c0_i32_0 = arith.constant 0 : i32
    %2 = arith.cmpi ne, %1, %c0_i32_0 : i32
    scf.if %2 {
      %cst_10 = arith.constant 0.000000e+00 : f32
      %12 = vector.broadcast %cst_10 : f32 to vector<128x128xf32>
      %c0_11 = arith.constant 0 : index
      %c0_12 = arith.constant 0 : index
      %13 = vector.load %arg7[%c0_11, %c0_12] : memref<128x128xf32, #tpu.memory_space<vmem>>, vector<128x128xf32>
      tpu.vector_store %arg7[%c0_11, %c0_12], %12 {strides = array<i32>} : memref<128x128xf32, #tpu.memory_space<vmem>>, vector<128x128xf32>,
    } else {
    }
    %c0 = arith.constant 0 : index
    %c0_1 = arith.constant 0 : index
    %3 = vector.load %arg7[%c0, %c0_1] : memref<128x128xf32, #tpu.memory_space<vmem>>, vector<128x128xf32>
    %c0_2 = arith.constant 0 : index
    %c0_3 = arith.constant 0 : index
    %4 = vector.load %arg3[%c0_2, %c0_3] : memref<128x128xbf16, #tpu.memory_space<vmem>>, vector<128x128xbf16>
    %c0_4 = arith.constant 0 : index
    %c0_5 = arith.constant 0 : index
    %5 = vector.load %arg4[%c0_4, %c0_5] : memref<128x128xbf16, #tpu.memory_space<vmem>>, vector<128x128xbf16>
    %cst = arith.constant dense<0.000000e+00> : vector<128x128xf32>
    %6 = tpu.matmul %4, %5, %cst {dimension_numbers = #tpu.dot_dimension_numbers<[1], [0], [0], [1], [0, 0, 1, 1], [], []>} : vector<128x128xbf16>, vector<128x128xbf16>, vector<128x128xf32> -> vector<128x128xf32>
    %7 = arith.addf %3, %6 : vector<128x128xf32>
    %c0_6 = arith.constant 0 : index
    %c0_7 = arith.constant 0 : index
    %8 = vector.load %arg7[%c0_6, %c0_7] : memref<128x128xf32, #tpu.memory_space<vmem>>, vector<128x128xf32>
    tpu.vector_store %arg7[%c0_6, %c0_7], %7 {strides = array<i32>} : memref<128x128xf32, #tpu.memory_space<vmem>>, vector<128x128xf32>,
    %c0_i32_8 = arith.constant 0 : i32
    %9 = arith.cmpi eq, %arg2, %c0_i32_8 : i32
    %10 = arith.extui %9 : i1 to i32
    %c0_i32_9 = arith.constant 0 : i32
    %11 = arith.cmpi ne, %10, %c0_i32_9 : i32
    scf.if %11 {
      %c0_10 = arith.constant 0 : index
      %c0_11 = arith.constant 0 : index
      %12 = vector.load %arg7[%c0_10, %c0_11] : memref<128x128xf32, #tpu.memory_space<vmem>>, vector<128x128xf32>
      %c0_12 = arith.constant 0 : index
      %c0_13 = arith.constant 0 : index
      %13 = vector.load %arg5[%c0_12, %c0_13] : memref<128x128xf32, #tpu.memory_space<vmem>>, vector<128x128xf32>
      %14 = arith.addf %12, %13 : vector<128x128xf32>
      %c0_14 = arith.constant 0 : index
      %c0_15 = arith.constant 0 : index
      %15 = vector.load %arg6[%c0_14, %c0_15] : memref<128x128xf32, #tpu.memory_space<vmem>>, vector<128x128xf32>
      tpu.vector_store %arg6[%c0_14, %c0_15], %14 {strides = array<i32>} : memref<128x128xf32, #tpu.memory_space<vmem>>, vector<128x128xf32>,
    } else {
    }
    return
  }
  func.func @transform_0(%arg0: i32, %arg1: i32, %arg2: i32) -> (i32, i32) {
    %c0_i32 = arith.constant 0 : i32
    return %arg0, %arg2 : i32, i32
  }
  func.func @transform_1(%arg0: i32, %arg1: i32, %arg2: i32) -> (i32, i32) {
    %c0_i32 = arith.constant 0 : i32
    return %arg2, %arg1 : i32, i32
  }
  func.func @transform_2(%arg0: i32, %arg1: i32, %arg2: i32) -> (i32, i32) {
    %c0_i32 = arith.constant 0 : i32
    return %arg0, %arg1 : i32, i32
  }
  func.func @transform_3(%arg0: i32, %arg1: i32, %arg2: i32) -> (i32, i32) {
    %c0_i32 = arith.constant 0 : i32
    return %arg0, %arg1 : i32, i32
  }
}

module attributes {stable_mosaic.version = 11 : i64} {
  func.func @_bn_relu_kernel(%arg0: i32, %arg1: memref<128x8xf32, #tpu.memory_space<vmem>>, %arg2: memref<1x8xf32, #tpu.memory_space<vmem>>, %arg3: memref<1x8xf32, #tpu.memory_space<vmem>>, %arg4: memref<128x8xf32, #tpu.memory_space<vmem>>) attributes {dimension_semantics = [#tpu.dimension_semantics<parallel>], iteration_bounds = array<i64: 1>, scalar_prefetch = 0 : i64, scratch_operands = 0 : i64, tpu.core_type = #tpu.core_type<tc>, window_params = [{transform_indices = @transform_0, window_bounds = array<i64: 128, 8>}, {pipeline_mode = #tpu.pipeline_mode<synchronous>, transform_indices = @transform_1, window_bounds = array<i64: 1, 8>}, {pipeline_mode = #tpu.pipeline_mode<synchronous>, transform_indices = @transform_2, window_bounds = array<i64: 1, 8>}, {transform_indices = @transform_3, window_bounds = array<i64: 128, 8>}]} {
    %c0 = arith.constant 0 : index
    %c0_0 = arith.constant 0 : index
    %0 = vector.load %arg1[%c0, %c0_0] : memref<128x8xf32, #tpu.memory_space<vmem>>, vector<128x8xf32>
    %c0_1 = arith.constant 0 : index
    %c0_2 = arith.constant 0 : index
    %1 = vector.load %arg2[%c0_1, %c0_2] : memref<1x8xf32, #tpu.memory_space<vmem>>, vector<1x8xf32>
    %2 = vector.broadcast %1 : vector<1x8xf32> to vector<128x8xf32>
    %3 = arith.mulf %0, %2 : vector<128x8xf32>
    %c0_3 = arith.constant 0 : index
    %c0_4 = arith.constant 0 : index
    %4 = vector.load %arg3[%c0_3, %c0_4] : memref<1x8xf32, #tpu.memory_space<vmem>>, vector<1x8xf32>
    %5 = vector.broadcast %4 : vector<1x8xf32> to vector<128x8xf32>
    %6 = arith.addf %3, %5 : vector<128x8xf32>
    %cst = arith.constant 0.000000e+00 : f32
    %7 = vector.broadcast %cst : f32 to vector<128x8xf32>
    %8 = arith.maximumf %6, %7 : vector<128x8xf32>
    %c0_5 = arith.constant 0 : index
    %c0_6 = arith.constant 0 : index
    %9 = vector.load %arg4[%c0_5, %c0_6] : memref<128x8xf32, #tpu.memory_space<vmem>>, vector<128x8xf32>
    tpu.vector_store %arg4[%c0_5, %c0_6], %8 {strides = array<i32>} : memref<128x8xf32, #tpu.memory_space<vmem>>, vector<128x8xf32>,
    return
  }
  func.func @transform_0(%arg0: i32) -> (i32, i32) {
    %c0_i32 = arith.constant 0 : i32
    %c0_i32_0 = arith.constant 0 : i32
    return %arg0, %c0_i32 : i32, i32
  }
  func.func @transform_1(%arg0: i32) -> (i32, i32) {
    %c0_i32 = arith.constant 0 : i32
    %c0_i32_0 = arith.constant 0 : i32
    %c0_i32_1 = arith.constant 0 : i32
    return %c0_i32, %c0_i32_0 : i32, i32
  }
  func.func @transform_2(%arg0: i32) -> (i32, i32) {
    %c0_i32 = arith.constant 0 : i32
    %c0_i32_0 = arith.constant 0 : i32
    %c0_i32_1 = arith.constant 0 : i32
    return %c0_i32, %c0_i32_0 : i32, i32
  }
  func.func @transform_3(%arg0: i32) -> (i32, i32) {
    %c0_i32 = arith.constant 0 : i32
    %c0_i32_0 = arith.constant 0 : i32
    return %arg0, %c0_i32 : i32, i32
  }
}

</mosaic_0001>

<bundles_post_ra>
// kernel: network_block_forward.7
= control target key start
LH: loop header
LB: loop body
LE: loop exit
PB: predicated region body
PF: predicated region fallthrough
CT: control target
= control target key end

     0   :  { %vm278_vm0 = vcmask 31744   ;;  %s958_s0 = inlined_call_operand.vmem [shape: f32[512,4], index: 0, kind: input, shape index: {}]   ;;  %s959_s1 = inlined_call_operand.vmem [shape: f32[1,4], index: 1, kind: input, shape index: {}]   ;;  %s960_s2 = inlined_call_operand.vmem [shape: f32[1,4], index: 2, kind: input, shape index: {}]   ;;  %s961_s3 = inlined_call_operand.vmem [shape: f32[512,4], index: 3, kind: output, shape index: {}]  }
   0x1   :  { %v14_v0 = vld [vmem:[%s958_s0] sm:$0xff]  ;;  %v15_v3 = vld [vmem:[%s958_s0 + $0x8] sm:$0xff]  ;;  %v16_v6 = vld [vmem:[%s958_s0 + $0x10] sm:$0xff] }
   0x2   :  { %v375_v1 = vld [vmem:[%s959_s1] ss:$0 sm:$0xff]  ;;  %v17_v7 = vld [vmem:[%s958_s0 + $0x18] sm:$0xff]  ;;  %v19_v12 = vld [vmem:[%s958_s0 + $0x28] sm:$0xff] }
   0x3   :  { %v380_v2 = vld [vmem:[%s960_s2] ss:$0 sm:$0xff]  ;;  %v82_v4 = vmul.f32 %v375_v1, %v14_v0  ;;  %v83_v5 = vmul.f32 %v375_v1, %v15_v3  ;;  %v84_v9 = vmul.f32 %v375_v1, %v16_v6  ;;  %v85_v10 = vmul.f32 %v375_v1, %v17_v7  ;;  %v20_v13 = vld [vmem:[%s958_s0 + $0x30] sm:$0xff]  ;;  %v21_v14 = vld [vmem:[%s958_s0 + $0x38] sm:$0xff] }
   0x4   :  { %v18_v8 = vld [vmem:[%s958_s0 + $0x20] sm:$0xff]  ;;  %v87_v17 = vmul.f32 %v375_v1, %v19_v12  ;;  %v88_v18 = vmul.f32 %v375_v1, %v20_v13  ;;  %v89_v22 = vmul.f32 %v375_v1, %v21_v14  ;;  %v23_v24 = vld [vmem:[%s958_s0 + $0x48] sm:$0xff]  ;;  %v24_v29 = vld [vmem:[%s958_s0 + $0x50] sm:$0xff] }
   0x5   :  { %v86_v11 = vmul.f32 %v375_v1, %v18_v8  ;;  %v150_v15 = vadd.f32 %v380_v2, %v82_v4  ;;  %v151_v16 = vadd.f32 %v380_v2, %v83_v5  ;;  %v152_v19 = vadd.f32 %v380_v2, %v84_v9  ;;  %v22_v23 = vld [vmem:[%s958_s0 + $0x40] sm:$0xff]  ;;  %v25_v30 = vld [vmem:[%s958_s0 + $0x58] sm:$0xff]  ;;  %v27_v35 = vld [vmem:[%s958_s0 + $0x68] sm:$0xff] }
   0x6   :  { %v153_v20 = vadd.f32 %v380_v2, %v85_v10  ;;  %v155_v27 = vadd.f32 %v380_v2, %v87_v17  ;;  %v156_v28 = vadd.f32 %v380_v2, %v88_v18  ;;  %v26_v31 = vld [vmem:[%s958_s0 + $0x60] sm:$0xff]  ;;  %v157_v34 = vadd.f32 %v380_v2, %v89_v22  ;;  %v28_v36 = vld [vmem:[%s958_s0 + $0x70] sm:$0xff]  ;;  %v29_v41 = vld [vmem:[%s958_s0 + $0x78] sm:$0xff] }
   0x7   :  { %v154_v21 = vadd.f32 %v380_v2, %v86_v11  ;;  %v214_v25 = vmax.f32 %v150_v15, 0.0  ;;  %v215_v26 = vmax.f32 %v151_v16, 0.0  ;;  %v216_v32 = vmax.f32 %v152_v19, 0.0  ;;  %v30_v54 = vld [vmem:[%s958_s0 + $0x80] sm:$0xff]  ;;  %v31_v55 = vld [vmem:[%s958_s0 + $0x88] sm:$0xff]  ;;  %v32_v58 = vld [vmem:[%s958_s0 + $0x90] sm:$0xff] }
   0x8   :  { %v217_v33 = vmax.f32 %v153_v20, 0.0  ;;  %v219_v38 = vmax.f32 %v155_v27, 0.0  ;;  %v90_v39 = vmul.f32 %v375_v1, %v22_v23  ;;  %v91_v40 = vmul.f32 %v375_v1, %v23_v24  ;;  %v33_v59 = vld [vmem:[%s958_s0 + $0x98] sm:$0xff]  ;;  %v34_v62 = vld [vmem:[%s958_s0 + $0xa0] sm:$0xff]  ;;  %v35_v5 = vld [vmem:[%s958_s0 + $0xa8] sm:$0xff] }
   0x9   :  { %279 = vst.msk [vmem:[%s961_s3] sm:$0xff] %vm278_vm0, %v214_v25  ;;  %v218_v37 = vmax.f32 %v154_v21, 0.0  ;;  %v220_v42 = vmax.f32 %v156_v28, 0.0  ;;  %v92_v43 = vmul.f32 %v375_v1, %v24_v29  ;;  %v93_v44 = vmul.f32 %v375_v1, %v25_v30  ;;  %v36_v10 = vld [vmem:[%s958_s0 + $0xb0] sm:$0xff]  ;;  %v37_v14 = vld [vmem:[%s958_s0 + $0xb8] sm:$0xff]  ;;  %v38_v18 = vld [vmem:[%s958_s0 + $0xc0] sm:$0xff] }
   0xa   :  { %280 = vst.msk [vmem:[%s961_s3 + $0x8] sm:$0xff] %vm278_vm0, %v215_v26  ;;  %v94_v45 = vmul.f32 %v375_v1, %v26_v31  ;;  %v158_v46 = vadd.f32 %v380_v2, %v90_v39  ;;  %v159_v47 = vadd.f32 %v380_v2, %v91_v40  ;;  %v95_v48 = vmul.f32 %v375_v1, %v27_v35  ;;  %v39_v22 = vld [vmem:[%s958_s0 + $0xc8] sm:$0xff]  ;;  %v40_v26 = vld [vmem:[%s958_s0 + $0xd0] sm:$0xff]  ;;  %v41_v30 = vld [vmem:[%s958_s0 + $0xd8] sm:$0xff] }
   0xb   :  { %281 = vst.msk [vmem:[%s961_s3 + $0x10] sm:$0xff] %vm278_vm0, %v216_v32  ;;  %v96_v49 = vmul.f32 %v375_v1, %v28_v36  ;;  %v221_v50 = vmax.f32 %v157_v34, 0.0  ;;  %v160_v51 = vadd.f32 %v380_v2, %v92_v43  ;;  %v161_v52 = vadd.f32 %v380_v2, %v93_v44  ;;  %v42_v34 = vld [vmem:[%s958_s0 + $0xe0] sm:$0xff] }
   0xc   :  { %282 = vst.msk [vmem:[%s961_s3 + $0x18] sm:$0xff] %vm278_vm0, %v217_v33  ;;  %v97_v53 = vmul.f32 %v375_v1, %v29_v41  ;;  %v222_v56 = vmax.f32 %v158_v46, 0.0  ;;  %v162_v57 = vadd.f32 %v380_v2, %v94_v45  ;;  %v223_v60 = vmax.f32 %v159_v47, 0.0  ;;  %v45_v46 = vld [vmem:[%s958_s0 + $0xf8] sm:$0xff] }
   0xd   :  { %283 = vst.msk [vmem:[%s961_s3 + $0x20] sm:$0xff] %vm278_vm0, %v218_v37  ;;  %v163_v61 = vadd.f32 %v380_v2, %v95_v48  ;;  %v224_v63 = vmax.f32 %v160_v51, 0.0  ;;  %v164_v0 = vadd.f32 %v380_v2, %v96_v49  ;;  %v98_v3 = vmul.f32 %v375_v1, %v30_v54  ;;  %v47_v54 = vld [vmem:[%s958_s0 + $0x108] sm:$0xff] }
   0xe   :  { %284 = vst.msk [vmem:[%s961_s3 + $0x28] sm:$0xff] %vm278_vm0, %v219_v38  ;;  %v99_v4 = vmul.f32 %v375_v1, %v31_v55  ;;  %v225_v6 = vmax.f32 %v161_v52, 0.0  ;;  %v165_v7 = vadd.f32 %v380_v2, %v97_v53  ;;  %v100_v8 = vmul.f32 %v375_v1, %v32_v58  ;;  %v43_v38 = vld [vmem:[%s958_s0 + $0xe8] sm:$0xff]  ;;  %v48_v58 = vld [vmem:[%s958_s0 + $0x110] sm:$0xff] }
   0xf   :  { %285 = vst.msk [vmem:[%s961_s3 + $0x30] sm:$0xff] %vm278_vm0, %v220_v42  ;;  %v101_v9 = vmul.f32 %v375_v1, %v33_v59  ;;  %v226_v11 = vmax.f32 %v162_v57, 0.0  ;;  %v166_v12 = vadd.f32 %v380_v2, %v98_v3  ;;  %v102_v13 = vmul.f32 %v375_v1, %v34_v62  ;;  %v44_v42 = vld [vmem:[%s958_s0 + $0xf0] sm:$0xff]  ;;  %v49_v62 = vld [vmem:[%s958_s0 + $0x118] sm:$0xff] }
  0x10   :  { %286 = vst.msk [vmem:[%s961_s3 + $0x38] sm:$0xff] %vm278_vm0, %v221_v50  ;;  %v227_v15 = vmax.f32 %v163_v61, 0.0  ;;  %v167_v16 = vadd.f32 %v380_v2, %v99_v4  ;;  %v103_v17 = vmul.f32 %v375_v1, %v35_v5  ;;  %v228_v19 = vmax.f32 %v164_v0, 0.0  ;;  %v46_v50 = vld [vmem:[%s958_s0 + $0x100] sm:$0xff] }
  0x11   :  { %287 = vst.msk [vmem:[%s961_s3 + $0x40] sm:$0xff] %vm278_vm0, %v222_v56  ;;  %v168_v20 = vadd.f32 %v380_v2, %v100_v8  ;;  %v104_v21 = vmul.f32 %v375_v1, %v36_v10  ;;  %v229_v23 = vmax.f32 %v165_v7, 0.0  ;;  %v169_v24 = vadd.f32 %v380_v2, %v101_v9  ;;  %v50_v4 = vld [vmem:[%s958_s0 + $0x120] sm:$0xff]  ;;  %v51_v8 = vld [vmem:[%s958_s0 + $0x128] sm:$0xff] }
  0x12   :  { %288 = vst.msk [vmem:[%s961_s3 + $0x48] sm:$0xff] %vm278_vm0, %v223_v60  ;;  %v105_v25 = vmul.f32 %v375_v1, %v37_v14  ;;  %v230_v27 = vmax.f32 %v166_v12, 0.0  ;;  %v170_v28 = vadd.f32 %v380_v2, %v102_v13  ;;  %v106_v29 = vmul.f32 %v375_v1, %v38_v18  ;;  %v52_v12 = vld [vmem:[%s958_s0 + $0x130] sm:$0xff] }
  0x13   :  { %289 = vst.msk [vmem:[%s961_s3 + $0x50] sm:$0xff] %vm278_vm0, %v224_v63  ;;  %v231_v31 = vmax.f32 %v167_v16, 0.0  ;;  %v171_v32 = vadd.f32 %v380_v2, %v103_v17  ;;  %v107_v33 = vmul.f32 %v375_v1, %v39_v22  ;;  %v232_v35 = vmax.f32 %v168_v20, 0.0  ;;  %v53_v16 = vld [vmem:[%s958_s0 + $0x138] sm:$0xff]  ;;  %v54_v20 = vld [vmem:[%s958_s0 + $0x140] sm:$0xff] }
  0x14   :  { %290 = vst.msk [vmem:[%s961_s3 + $0x58] sm:$0xff] %vm278_vm0, %v225_v6  ;;  %v172_v36 = vadd.f32 %v380_v2, %v104_v21  ;;  %v108_v37 = vmul.f32 %v375_v1, %v40_v26  ;;  %v233_v39 = vmax.f32 %v169_v24, 0.0  ;;  %v173_v40 = vadd.f32 %v380_v2, %v105_v25  ;;  %v55_v24 = vld [vmem:[%s958_s0 + $0x148] sm:$0xff] }
  0x15   :  { %291 = vst.msk [vmem:[%s961_s3 + $0x60] sm:$0xff] %vm278_vm0, %v226_v11  ;;  %v109_v41 = vmul.f32 %v375_v1, %v41_v30  ;;  %v234_v43 = vmax.f32 %v170_v28, 0.0  ;;  %v174_v44 = vadd.f32 %v380_v2, %v106_v29  ;;  %v110_v45 = vmul.f32 %v375_v1, %v42_v34  ;;  %v56_v28 = vld [vmem:[%s958_s0 + $0x150] sm:$0xff] }
  0x16   :  { %292 = vst.msk [vmem:[%s961_s3 + $0x68] sm:$0xff] %vm278_vm0, %v227_v15  ;;  %v235_v47 = vmax.f32 %v171_v32, 0.0  ;;  %v175_v48 = vadd.f32 %v380_v2, %v107_v33  ;;  %v111_v49 = vmul.f32 %v375_v1, %v43_v38  ;;  %v236_v51 = vmax.f32 %v172_v36, 0.0  ;;  %v57_v32 = vld [vmem:[%s958_s0 + $0x158] sm:$0xff]  ;;  %v58_v36 = vld [vmem:[%s958_s0 + $0x160] sm:$0xff] }
  0x17   :  { %293 = vst.msk [vmem:[%s961_s3 + $0x70] sm:$0xff] %vm278_vm0, %v228_v19  ;;  %v176_v52 = vadd.f32 %v380_v2, %v108_v37  ;;  %v112_v53 = vmul.f32 %v375_v1, %v44_v42  ;;  %v237_v55 = vmax.f32 %v173_v40, 0.0  ;;  %v177_v56 = vadd.f32 %v380_v2, %v109_v41  ;;  %v59_v40 = vld [vmem:[%s958_s0 + $0x168] sm:$0xff] }
  0x18   :  { %294 = vst.msk [vmem:[%s961_s3 + $0x78] sm:$0xff] %vm278_vm0, %v229_v23  ;;  %v113_v57 = vmul.f32 %v375_v1, %v45_v46  ;;  %v238_v59 = vmax.f32 %v174_v44, 0.0  ;;  %v178_v60 = vadd.f32 %v380_v2, %v110_v45  ;;  %v114_v61 = vmul.f32 %v375_v1, %v46_v50  ;;  %v60_v44 = vld [vmem:[%s958_s0 + $0x170] sm:$0xff] }
  0x19   :  { %295 = vst.msk [vmem:[%s961_s3 + $0x80] sm:$0xff] %vm278_vm0, %v230_v27  ;;  %v239_v63 = vmax.f32 %v175_v48, 0.0  ;;  %v179_v0 = vadd.f32 %v380_v2, %v111_v49  ;;  %v115_v3 = vmul.f32 %v375_v1, %v47_v54  ;;  %v240_v5 = vmax.f32 %v176_v52, 0.0  ;;  %v61_v48 = vld [vmem:[%s958_s0 + $0x178] sm:$0xff]  ;;  %v62_v52 = vld [vmem:[%s958_s0 + $0x180] sm:$0xff] }
  0x1a   :  { %296 = vst.msk [vmem:[%s961_s3 + $0x88] sm:$0xff] %vm278_vm0, %v231_v31  ;;  %v180_v6 = vadd.f32 %v380_v2, %v112_v53  ;;  %v116_v7 = vmul.f32 %v375_v1, %v48_v58  ;;  %v241_v9 = vmax.f32 %v177_v56, 0.0  ;;  %v181_v10 = vadd.f32 %v380_v2, %v113_v57  ;;  %v63_v56 = vld [vmem:[%s958_s0 + $0x188] sm:$0xff] }
  0x1b   :  { %297 = vst.msk [vmem:[%s961_s3 + $0x90] sm:$0xff] %vm278_vm0, %v232_v35  ;;  %v117_v11 = vmul.f32 %v375_v1, %v49_v62  ;;  %v242_v13 = vmax.f32 %v178_v60, 0.0  ;;  %v182_v14 = vadd.f32 %v380_v2, %v114_v61  ;;  %v118_v15 = vmul.f32 %v375_v1, %v50_v4  ;;  %v64_v60 = vld [vmem:[%s958_s0 + $0x190] sm:$0xff] }
  0x1c   :  { %298 = vst.msk [vmem:[%s961_s3 + $0x98] sm:$0xff] %vm278_vm0, %v233_v39  ;;  %v243_v17 = vmax.f32 %v179_v0, 0.0  ;;  %v183_v18 = vadd.f32 %v380_v2, %v115_v3  ;;  %v119_v19 = vmul.f32 %v375_v1, %v51_v8  ;;  %v244_v21 = vmax.f32 %v180_v6, 0.0  ;;  %v65_v0 = vld [vmem:[%s958_s0 + $0x198] sm:$0xff] }
  0x1d   :  { %299 = vst.msk [vmem:[%s961_s3 + $0xa0] sm:$0xff] %vm278_vm0, %v234_v43  ;;  %v184_v22 = vadd.f32 %v380_v2, %v116_v7  ;;  %v120_v23 = vmul.f32 %v375_v1, %v52_v12  ;;  %v245_v25 = vmax.f32 %v181_v10, 0.0  ;;  %v185_v26 = vadd.f32 %v380_v2, %v117_v11  ;;  %v77_v3 = vld [vmem:[%s958_s0 + $0x1f8] sm:$0xff]  ;;  %v66_v7 = vld [vmem:[%s958_s0 + $0x1a0] sm:$0xff]  ;;  %v67_v11 = vld [vmem:[%s958_s0 + $0x1a8] sm:$0xff] }
  0x1e   :  { %300 = vst.msk [vmem:[%s961_s3 + $0xa8] sm:$0xff] %vm278_vm0, %v235_v47  ;;  %v121_v27 = vmul.f32 %v375_v1, %v53_v16  ;;  %v246_v29 = vmax.f32 %v182_v14, 0.0  ;;  %v186_v30 = vadd.f32 %v380_v2, %v118_v15  ;;  %v122_v31 = vmul.f32 %v375_v1, %v54_v20  ;;  %v68_v15 = vld [vmem:[%s958_s0 + $0x1b0] sm:$0xff]  ;;  %v69_v20 = vld [vmem:[%s958_s0 + $0x1b8] sm:$0xff] }
  0x1f   :  { %301 = vst.msk [vmem:[%s961_s3 + $0xb0] sm:$0xff] %vm278_vm0, %v236_v51  ;;  %v247_v33 = vmax.f32 %v183_v18, 0.0  ;;  %v187_v34 = vadd.f32 %v380_v2, %v119_v19  ;;  %v123_v35 = vmul.f32 %v375_v1, %v55_v24  ;;  %v248_v37 = vmax.f32 %v184_v22, 0.0  ;;  %v70_v24 = vld [vmem:[%s958_s0 + $0x1c0] sm:$0xff] }
  0x20   :  { %302 = vst.msk [vmem:[%s961_s3 + $0xb8] sm:$0xff] %vm278_vm0, %v237_v55  ;;  %v188_v38 = vadd.f32 %v380_v2, %v120_v23  ;;  %v124_v39 = vmul.f32 %v375_v1, %v56_v28  ;;  %v249_v41 = vmax.f32 %v185_v26, 0.0  ;;  %v189_v42 = vadd.f32 %v380_v2, %v121_v27 }
  0x21   :  { %303 = vst.msk [vmem:[%s961_s3 + $0xc0] sm:$0xff] %vm278_vm0, %v238_v59  ;;  %v125_v43 = vmul.f32 %v375_v1, %v57_v32  ;;  %v250_v45 = vmax.f32 %v186_v30, 0.0  ;;  %v190_v46 = vadd.f32 %v380_v2, %v122_v31  ;;  %v126_v47 = vmul.f32 %v375_v1, %v58_v36 }
  0x22   :  { %304 = vst.msk [vmem:[%s961_s3 + $0xc8] sm:$0xff] %vm278_vm0, %v239_v63  ;;  %v251_v49 = vmax.f32 %v187_v34, 0.0  ;;  %v191_v50 = vadd.f32 %v380_v2, %v123_v35  ;;  %v127_v51 = vmul.f32 %v375_v1, %v59_v40  ;;  %v252_v53 = vmax.f32 %v188_v38, 0.0 }
  0x23   :  { %305 = vst.msk [vmem:[%s961_s3 + $0xd0] sm:$0xff] %vm278_vm0, %v240_v5  ;;  %v192_v54 = vadd.f32 %v380_v2, %v124_v39  ;;  %v128_v55 = vmul.f32 %v375_v1, %v60_v44  ;;  %v253_v57 = vmax.f32 %v189_v42, 0.0  ;;  %v193_v58 = vadd.f32 %v380_v2, %v125_v43 }
  0x24   :  { %306 = vst.msk [vmem:[%s961_s3 + $0xd8] sm:$0xff] %vm278_vm0, %v241_v9  ;;  %v129_v59 = vmul.f32 %v375_v1, %v61_v48  ;;  %v254_v61 = vmax.f32 %v190_v46, 0.0  ;;  %v194_v62 = vadd.f32 %v380_v2, %v126_v47  ;;  %v130_v63 = vmul.f32 %v375_v1, %v62_v52 }
  0x25   :  { %307 = vst.msk [vmem:[%s961_s3 + $0xe0] sm:$0xff] %vm278_vm0, %v242_v13  ;;  %v255_v4 = vmax.f32 %v191_v50, 0.0  ;;  %v195_v5 = vadd.f32 %v380_v2, %v127_v51  ;;  %v131_v6 = vmul.f32 %v375_v1, %v63_v56  ;;  %v256_v8 = vmax.f32 %v192_v54, 0.0 }
  0x26   :  { %308 = vst.msk [vmem:[%s961_s3 + $0xe8] sm:$0xff] %vm278_vm0, %v243_v17  ;;  %v196_v9 = vadd.f32 %v380_v2, %v128_v55  ;;  %v132_v10 = vmul.f32 %v375_v1, %v64_v60  ;;  %v257_v12 = vmax.f32 %v193_v58, 0.0  ;;  %v197_v13 = vadd.f32 %v380_v2, %v129_v59 }
  0x27   :  { %309 = vst.msk [vmem:[%s961_s3 + $0xf0] sm:$0xff] %vm278_vm0, %v244_v21  ;;  %v133_v14 = vmul.f32 %v375_v1, %v65_v0  ;;  %v145_v16 = vmul.f32 %v375_v1, %v77_v3  ;;  %v258_v17 = vmax.f32 %v194_v62, 0.0  ;;  %v198_v18 = vadd.f32 %v380_v2, %v130_v63 }
  0x28   :  { %310 = vst.msk [vmem:[%s961_s3 + $0xf8] sm:$0xff] %vm278_vm0, %v245_v25  ;;  %v134_v19 = vmul.f32 %v375_v1, %v66_v7  ;;  %v259_v21 = vmax.f32 %v195_v5, 0.0  ;;  %v199_v22 = vadd.f32 %v380_v2, %v131_v6  ;;  %v135_v23 = vmul.f32 %v375_v1, %v67_v11 }
  0x29   :  { %311 = vst.msk [vmem:[%s961_s3 + $0x100] sm:$0xff] %vm278_vm0, %v246_v29  ;;  %v827_v25 = vadd.f32 %v380_v2, %v145_v16  ;;  %v260_v26 = vmax.f32 %v196_v9, 0.0  ;;  %v200_v27 = vadd.f32 %v380_v2, %v132_v10  ;;  %v136_v28 = vmul.f32 %v375_v1, %v68_v15  ;;  %v71_v29 = vld [vmem:[%s958_s0 + $0x1c8] sm:$0xff] }
  0x2a   :  { %312 = vst.msk [vmem:[%s961_s3 + $0x108] sm:$0xff] %vm278_vm0, %v247_v33  ;;  %v261_v30 = vmax.f32 %v197_v13, 0.0  ;;  %v201_v31 = vadd.f32 %v380_v2, %v133_v14  ;;  %v137_v32 = vmul.f32 %v375_v1, %v69_v20  ;;  %v72_v33 = vld [vmem:[%s958_s0 + $0x1d0] sm:$0xff]  ;;  %v262_v34 = vmax.f32 %v198_v18, 0.0 }
  0x2b   :  { %313 = vst.msk [vmem:[%s961_s3 + $0x110] sm:$0xff] %vm278_vm0, %v248_v37  ;;  %v202_v35 = vadd.f32 %v380_v2, %v134_v19  ;;  %v138_v36 = vmul.f32 %v375_v1, %v70_v24  ;;  %v73_v37 = vld [vmem:[%s958_s0 + $0x1d8] sm:$0xff]  ;;  %v263_v38 = vmax.f32 %v199_v22, 0.0  ;;  %v203_v39 = vadd.f32 %v380_v2, %v135_v23 }
  0x2c   :  { %314 = vst.msk [vmem:[%s961_s3 + $0x118] sm:$0xff] %vm278_vm0, %v249_v41  ;;  %v139_v40 = vmul.f32 %v375_v1, %v71_v29  ;;  %v74_v41 = vld [vmem:[%s958_s0 + $0x1e0] sm:$0xff]  ;;  %v264_v42 = vmax.f32 %v200_v27, 0.0  ;;  %v204_v43 = vadd.f32 %v380_v2, %v136_v28  ;;  %v140_v44 = vmul.f32 %v375_v1, %v72_v33 }
  0x2d   :  { %315 = vst.msk [vmem:[%s961_s3 + $0x120] sm:$0xff] %vm278_vm0, %v250_v45  ;;  %v75_v45 = vld [vmem:[%s958_s0 + $0x1e8] sm:$0xff]  ;;  %v265_v46 = vmax.f32 %v201_v31, 0.0  ;;  %v205_v47 = vadd.f32 %v380_v2, %v137_v32  ;;  %v141_v48 = vmul.f32 %v375_v1, %v73_v37  ;;  %v266_v50 = vmax.f32 %v202_v35, 0.0 }
  0x2e   :  { %316 = vst.msk [vmem:[%s961_s3 + $0x128] sm:$0xff] %vm278_vm0, %v251_v49  ;;  %v76_v49 = vld [vmem:[%s958_s0 + $0x1f0] sm:$0xff]  ;;  %v206_v51 = vadd.f32 %v380_v2, %v138_v36  ;;  %v142_v52 = vmul.f32 %v375_v1, %v74_v41  ;;  %v207_v54 = vadd.f32 %v380_v2, %v139_v40  ;;  %v143_v55 = vmul.f32 %v375_v1, %v75_v45 }
  0x2f   :  { %317 = vst.msk [vmem:[%s961_s3 + $0x130] sm:$0xff] %vm278_vm0, %v252_v53  ;;  %v267_v53 = vmax.f32 %v203_v39, 0.0  ;;  %v268_v56 = vmax.f32 %v204_v43, 0.0  ;;  %v144_v58 = vmul.f32 %v375_v1, %v76_v49  ;;  %v269_v59 = vmax.f32 %v205_v47, 0.0 }
  0x30   :  { %318 = vst.msk [vmem:[%s961_s3 + $0x138] sm:$0xff] %vm278_vm0, %v253_v57  ;;  %v208_v57 = vadd.f32 %v380_v2, %v140_v44  ;;  %v209_v60 = vadd.f32 %v380_v2, %v141_v48  ;;  %v210_v62 = vadd.f32 %v380_v2, %v142_v52  ;;  %v271_v1 = vmax.f32 %v207_v54, 0.0 }
  0x31   :  { %319 = vst.msk [vmem:[%s961_s3 + $0x140] sm:$0xff] %vm278_vm0, %v254_v61  ;;  %v270_v61 = vmax.f32 %v206_v51, 0.0  ;;  %v211_v63 = vadd.f32 %v380_v2, %v143_v55  ;;  %v212_v3 = vadd.f32 %v380_v2, %v144_v58  ;;  %v277_v7 = vmax.f32 %v827_v25, 0.0 }
  0x32   :  { %320 = vst.msk [vmem:[%s961_s3 + $0x148] sm:$0xff] %vm278_vm0, %v255_v4  ;;  %v272_v0 = vmax.f32 %v208_v57, 0.0  ;;  %v273_v4 = vmax.f32 %v209_v60, 0.0  ;;  %v274_v5 = vmax.f32 %v210_v62, 0.0 }
  0x33   :  { %321 = vst.msk [vmem:[%s961_s3 + $0x150] sm:$0xff] %vm278_vm0, %v256_v8  ;;  %v275_v6 = vmax.f32 %v211_v63, 0.0  ;;  %v276_v2 = vmax.f32 %v212_v3, 0.0 }
  0x34   :  { %322 = vst.msk [vmem:[%s961_s3 + $0x158] sm:$0xff] %vm278_vm0, %v257_v12 }
  0x35   :  { %323 = vst.msk [vmem:[%s961_s3 + $0x160] sm:$0xff] %vm278_vm0, %v258_v17 }
  0x36   :  { %324 = vst.msk [vmem:[%s961_s3 + $0x168] sm:$0xff] %vm278_vm0, %v259_v21 }
  0x37   :  { %325 = vst.msk [vmem:[%s961_s3 + $0x170] sm:$0xff] %vm278_vm0, %v260_v26 }
  0x38   :  { %326 = vst.msk [vmem:[%s961_s3 + $0x178] sm:$0xff] %vm278_vm0, %v261_v30 }
  0x39   :  { %327 = vst.msk [vmem:[%s961_s3 + $0x180] sm:$0xff] %vm278_vm0, %v262_v34 }
  0x3a   :  { %328 = vst.msk [vmem:[%s961_s3 + $0x188] sm:$0xff] %vm278_vm0, %v263_v38 }
  0x3b   :  { %329 = vst.msk [vmem:[%s961_s3 + $0x190] sm:$0xff] %vm278_vm0, %v264_v42 }
  0x3c   :  { %330 = vst.msk [vmem:[%s961_s3 + $0x198] sm:$0xff] %vm278_vm0, %v265_v46 }
  0x3d   :  { %331 = vst.msk [vmem:[%s961_s3 + $0x1a0] sm:$0xff] %vm278_vm0, %v266_v50 }
  0x3e   :  { %332 = vst.msk [vmem:[%s961_s3 + $0x1a8] sm:$0xff] %vm278_vm0, %v267_v53 }
  0x3f   :  { %333 = vst.msk [vmem:[%s961_s3 + $0x1b0] sm:$0xff] %vm278_vm0, %v268_v56 }
  0x40   :  { %334 = vst.msk [vmem:[%s961_s3 + $0x1b8] sm:$0xff] %vm278_vm0, %v269_v59 }
  0x41   :  { %335 = vst.msk [vmem:[%s961_s3 + $0x1c0] sm:$0xff] %vm278_vm0, %v270_v61 }
  0x42   :  { %336 = vst.msk [vmem:[%s961_s3 + $0x1c8] sm:$0xff] %vm278_vm0, %v271_v1 }
  0x43   :  { %337 = vst.msk [vmem:[%s961_s3 + $0x1d0] sm:$0xff] %vm278_vm0, %v272_v0 }
  0x44   :  { %338 = vst.msk [vmem:[%s961_s3 + $0x1d8] sm:$0xff] %vm278_vm0, %v273_v4 }
  0x45   :  { %339 = vst.msk [vmem:[%s961_s3 + $0x1e0] sm:$0xff] %vm278_vm0, %v274_v5 }
  0x46   :  { %340 = vst.msk [vmem:[%s961_s3 + $0x1e8] sm:$0xff] %vm278_vm0, %v275_v6 }
  0x47   :  { %341 = vst.msk [vmem:[%s961_s3 + $0x1f0] sm:$0xff] %vm278_vm0, %v276_v2 }
  0x48   :  { %342 = vst.msk [vmem:[%s961_s3 + $0x1f8] sm:$0xff] %vm278_vm0, %v277_v7 }

// kernel: network_block_forward.8
= control target key start
LH: loop header
LB: loop body
LE: loop exit
PB: predicated region body
PF: predicated region fallthrough
CT: control target
= control target key end

     0   :  { %s510_s1 = inlined_call_operand.vmem [shape: bf16[128,128], index: 1, kind: input, shape index: {}]   ;;  %s511_s0 = inlined_call_operand.vmem [shape: bf16[128,128], index: 0, kind: input, shape index: {}]   ;;  %s512_s2 = inlined_call_operand.vmem [shape: f32[128,128], index: 2, kind: output, shape index: {}]  }
   0x1   :  { %v374_v0 = vld [vmem:[%s510_s1 + $0x38] sm:$0xff]  ;;  %v373_v1 = vld [vmem:[%s510_s1 + $0x30] sm:$0xff]  ;;  %v372_v2 = vld [vmem:[%s510_s1 + $0x28] sm:$0xff] }
   0x2   :  { %175 = vmatpush.bf16.msra.mxu0 %v374_v0  ;;  %375 = vmatpush.bf16.msra.mxu1 %v374_v0  ;;  %v371_v3 = vld [vmem:[%s510_s1 + $0x20] sm:$0xff]  ;;  %v370_v4 = vld [vmem:[%s510_s1 + $0x18] sm:$0xff]  ;;  %v369_v5 = vld [vmem:[%s510_s1 + $0x10] sm:$0xff] }
   0x3   :  { %376 = vmatpush.bf16.msra.mxu2 %v374_v0  ;;  %377 = vmatpush.bf16.msra.mxu3 %v374_v0  ;;  %v368_v6 = vld [vmem:[%s510_s1 + $0x8] sm:$0xff]  ;;  %v367_v7 = vld [vmem:[%s510_s1] sm:$0xff]  ;;  %v361_v9 = vld [vmem:[%s511_s0 + $0x10] sm:$0xff] }
   0x4   :  { %v359_v8 = vld [vmem:[%s511_s0] sm:$0xff]  ;;  %v365_v11 = vld [vmem:[%s511_s0 + $0x30] sm:$0xff]  ;;  %v360_v12 = vld [vmem:[%s511_s0 + $0x8] sm:$0xff] }
   0x5   :  { %v363_v10 = vld [vmem:[%s511_s0 + $0x20] sm:$0xff]  ;;  %v362_v13 = vld [vmem:[%s511_s0 + $0x18] sm:$0xff]  ;;  %v364_v14 = vld [vmem:[%s511_s0 + $0x28] sm:$0xff] }
   0x6   :  { %176 = vmatpush.bf16.msra.mxu0 %v373_v1  ;;  %378 = vmatpush.bf16.msra.mxu1 %v373_v1  ;;  %v366_v15 = vld [vmem:[%s511_s0 + $0x38] sm:$0xff] }
   0x7   :  { %379 = vmatpush.bf16.msra.mxu2 %v373_v1  ;;  %380 = vmatpush.bf16.msra.mxu3 %v373_v1 }
   0xa   :  { %177 = vmatpush.bf16.msra.mxu0 %v372_v2  ;;  %381 = vmatpush.bf16.msra.mxu1 %v372_v2 }
   0xb   :  { %382 = vmatpush.bf16.msra.mxu2 %v372_v2  ;;  %383 = vmatpush.bf16.msra.mxu3 %v372_v2 }
   0xe   :  { %178 = vmatpush.bf16.msra.mxu0 %v371_v3  ;;  %384 = vmatpush.bf16.msra.mxu1 %v371_v3 }
   0xf   :  { %385 = vmatpush.bf16.msra.mxu2 %v371_v3  ;;  %386 = vmatpush.bf16.msra.mxu3 %v371_v3 }
  0x12   :  { %179 = vmatpush.bf16.msra.mxu0 %v370_v4  ;;  %387 = vmatpush.bf16.msra.mxu1 %v370_v4 }
  0x13   :  { %388 = vmatpush.bf16.msra.mxu2 %v370_v4  ;;  %389 = vmatpush.bf16.msra.mxu3 %v370_v4 }
  0x16   :  { %180 = vmatpush.bf16.msra.mxu0 %v369_v5  ;;  %390 = vmatpush.bf16.msra.mxu1 %v369_v5 }
  0x17   :  { %391 = vmatpush.bf16.msra.mxu2 %v369_v5  ;;  %392 = vmatpush.bf16.msra.mxu3 %v369_v5 }
  0x1a   :  { %181 = vmatpush.bf16.msra.mxu0 %v368_v6  ;;  %393 = vmatpush.bf16.msra.mxu1 %v368_v6 }
  0x1b   :  { %394 = vmatpush.bf16.msra.mxu2 %v368_v6  ;;  %395 = vmatpush.bf16.msra.mxu3 %v368_v6 }
  0x1e   :  { %182 = vmatpush.bf16.msra.mxu0 %v367_v7  ;;  %396 = vmatpush.bf16.msra.mxu1 %v367_v7 }
  0x1f   :  { %397 = vmatpush.bf16.msra.mxu2 %v367_v7  ;;  %398 = vmatpush.bf16.msra.mxu3 %v367_v7 }
  0x21   :  { %183 = vmatmul.bf16.vlgmr.msra.gmra.mxu0 %v359_v8  ;;  %193 = vmatmul.bf16.vlgmr.msra.gmra.mxu1 %v361_v9 }
  0x22   :  { %203 = vmatmul.bf16.vlgmr.msra.gmra.mxu2 %v363_v10  ;;  %213 = vmatmul.bf16.vlgmr.msra.gmra.mxu3 %v365_v11 }
  0x31   :  { %188 = vmatmul.bf16.gmra.mxu0 %v360_v12  ;;  %198 = vmatmul.bf16.gmra.mxu1 %v362_v13 }
  0x32   :  { %208 = vmatmul.bf16.gmra.mxu2 %v364_v14  ;;  %218 = vmatmul.bf16.gmra.mxu3 %v366_v15 }
  0x9e   :  { %v184_v16 = vpop.f32.mrf.mxu0  ;;  %v194_v17 = vpop.f32.mrf.mxu1 }
  0x9f   :  { %275 = vst [vmem:[%s512_s2] sm:$0xff] %v184_v16 }
  0xa0   :  { %279 = vst [vmem:[%s512_s2 + $0x20] sm:$0xff] %v194_v17 }
  0xa5   :  { %v204_v18 = vpop.f32.mrf.mxu2  ;;  %v214_v19 = vpop.f32.mrf.mxu3 }
  0xa6   :  { %283 = vst [vmem:[%s512_s2 + $0x40] sm:$0xff] %v204_v18  ;;  %v186_v20 = vpop.f32.mrf.mxu0  ;;  %v196_v21 = vpop.f32.mrf.mxu1 }
  0xa7   :  { %287 = vst [vmem:[%s512_s2 + $0x60] sm:$0xff] %v214_v19 }
  0xa8   :  { %276 = vst [vmem:[%s512_s2 + $0x8] sm:$0xff] %v186_v20 }
  0xa9   :  { %280 = vst [vmem:[%s512_s2 + $0x28] sm:$0xff] %v196_v21 }
  0xad   :  { %v206_v22 = vpop.f32.mrf.mxu2  ;;  %v216_v23 = vpop.f32.mrf.mxu3 }
  0xae   :  { %284 = vst [vmem:[%s512_s2 + $0x48] sm:$0xff] %v206_v22  ;;  %v189_v24 = vpop.f32.mrf.mxu0  ;;  %v199_v25 = vpop.f32.mrf.mxu1 }
  0xaf   :  { %288 = vst [vmem:[%s512_s2 + $0x68] sm:$0xff] %v216_v23 }
  0xb0   :  { %277 = vst [vmem:[%s512_s2 + $0x10] sm:$0xff] %v189_v24 }
  0xb1   :  { %281 = vst [vmem:[%s512_s2 + $0x30] sm:$0xff] %v199_v25 }
  0xb5   :  { %v209_v26 = vpop.f32.mrf.mxu2  ;;  %v219_v27 = vpop.f32.mrf.mxu3 }
  0xb6   :  { %285 = vst [vmem:[%s512_s2 + $0x50] sm:$0xff] %v209_v26  ;;  %v191_v28 = vpop.f32.mrf.mxu0  ;;  %v201_v29 = vpop.f32.mrf.mxu1 }
  0xb7   :  { %289 = vst [vmem:[%s512_s2 + $0x70] sm:$0xff] %v219_v27 }
  0xb8   :  { %278 = vst [vmem:[%s512_s2 + $0x18] sm:$0xff] %v191_v28 }
  0xb9   :  { %282 = vst [vmem:[%s512_s2 + $0x38] sm:$0xff] %v201_v29 }
  0xbd   :  { %v211_v30 = vpop.f32.mrf.mxu2  ;;  %v221_v31 = vpop.f32.mrf.mxu3 }
  0xbe   :  { %286 = vst [vmem:[%s512_s2 + $0x58] sm:$0xff] %v211_v30 }
  0xbf   :  { %290 = vst [vmem:[%s512_s2 + $0x78] sm:$0xff] %v221_v31 }

// kernel: network_block_forward.9
= control target key start
LH: loop header
LB: loop body
LE: loop exit
PB: predicated region body
PF: predicated region fallthrough
CT: control target
= control target key end

     0   :  { %s626_s1 = inlined_call_operand.vmem [shape: bf16[128,128], index: 1, kind: input, shape index: {}]   ;;  %s627_s2 = inlined_call_operand.vmem [shape: f32[1,128], index: 2, kind: input, shape index: {}]   ;;  %s628_s3 = inlined_call_operand.vmem [shape: f32[1,128], index: 3, kind: input, shape index: {}]   ;;  %s629_s0 = inlined_call_operand.vmem [shape: bf16[128,128], index: 0, kind: input, shape index: {}]   ;;  %s630_s4 = inlined_call_operand.vmem [shape: f32[128,128], index: 4, kind: output, shape index: {}]  }
   0x1   :  { %v436_v0 = vld [vmem:[%s626_s1 + $0x38] sm:$0xff]  ;;  %v435_v1 = vld [vmem:[%s626_s1 + $0x30] sm:$0xff]  ;;  %v434_v2 = vld [vmem:[%s626_s1 + $0x28] sm:$0xff] }
   0x2   :  { %181 = vmatpush.bf16.msra.mxu0 %v436_v0  ;;  %437 = vmatpush.bf16.msra.mxu1 %v436_v0  ;;  %v433_v3 = vld [vmem:[%s626_s1 + $0x20] sm:$0xff]  ;;  %v432_v4 = vld [vmem:[%s626_s1 + $0x18] sm:$0xff]  ;;  %v431_v5 = vld [vmem:[%s626_s1 + $0x10] sm:$0xff] }
   0x3   :  { %438 = vmatpush.bf16.msra.mxu2 %v436_v0  ;;  %439 = vmatpush.bf16.msra.mxu3 %v436_v0  ;;  %v430_v6 = vld [vmem:[%s626_s1 + $0x8] sm:$0xff]  ;;  %v429_v7 = vld [vmem:[%s626_s1] sm:$0xff]  ;;  %v423_v9 = vld [vmem:[%s629_s0 + $0x10] sm:$0xff] }
   0x4   :  { %v421_v8 = vld [vmem:[%s629_s0] sm:$0xff]  ;;  %v427_v11 = vld [vmem:[%s629_s0 + $0x30] sm:$0xff]  ;;  %v422_v12 = vld [vmem:[%s629_s0 + $0x8] sm:$0xff] }
   0x5   :  { %v425_v10 = vld [vmem:[%s629_s0 + $0x20] sm:$0xff]  ;;  %v424_v13 = vld [vmem:[%s629_s0 + $0x18] sm:$0xff]  ;;  %v426_v14 = vld [vmem:[%s629_s0 + $0x28] sm:$0xff] }
   0x6   :  { %182 = vmatpush.bf16.msra.mxu0 %v435_v1  ;;  %440 = vmatpush.bf16.msra.mxu1 %v435_v1  ;;  %v428_v15 = vld [vmem:[%s629_s0 + $0x38] sm:$0xff]  ;;  %v539_v16 = vld [vmem:[%s627_s2] ss:$0 sm:$0xff] }
   0x7   :  { %441 = vmatpush.bf16.msra.mxu2 %v435_v1  ;;  %442 = vmatpush.bf16.msra.mxu3 %v435_v1  ;;  %v544_v17 = vld [vmem:[%s628_s3] ss:$0 sm:$0xff] }
   0xa   :  { %183 = vmatpush.bf16.msra.mxu0 %v434_v2  ;;  %443 = vmatpush.bf16.msra.mxu1 %v434_v2 }
   0xb   :  { %444 = vmatpush.bf16.msra.mxu2 %v434_v2  ;;  %445 = vmatpush.bf16.msra.mxu3 %v434_v2 }
   0xe   :  { %184 = vmatpush.bf16.msra.mxu0 %v433_v3  ;;  %446 = vmatpush.bf16.msra.mxu1 %v433_v3 }
   0xf   :  { %447 = vmatpush.bf16.msra.mxu2 %v433_v3  ;;  %448 = vmatpush.bf16.msra.mxu3 %v433_v3 }
  0x12   :  { %185 = vmatpush.bf16.msra.mxu0 %v432_v4  ;;  %449 = vmatpush.bf16.msra.mxu1 %v432_v4 }
  0x13   :  { %450 = vmatpush.bf16.msra.mxu2 %v432_v4  ;;  %451 = vmatpush.bf16.msra.mxu3 %v432_v4 }
  0x16   :  { %186 = vmatpush.bf16.msra.mxu0 %v431_v5  ;;  %452 = vmatpush.bf16.msra.mxu1 %v431_v5 }
  0x17   :  { %453 = vmatpush.bf16.msra.mxu2 %v431_v5  ;;  %454 = vmatpush.bf16.msra.mxu3 %v431_v5 }
  0x1a   :  { %187 = vmatpush.bf16.msra.mxu0 %v430_v6  ;;  %455 = vmatpush.bf16.msra.mxu1 %v430_v6 }
  0x1b   :  { %456 = vmatpush.bf16.msra.mxu2 %v430_v6  ;;  %457 = vmatpush.bf16.msra.mxu3 %v430_v6 }
  0x1e   :  { %188 = vmatpush.bf16.msra.mxu0 %v429_v7  ;;  %458 = vmatpush.bf16.msra.mxu1 %v429_v7 }
  0x1f   :  { %459 = vmatpush.bf16.msra.mxu2 %v429_v7  ;;  %460 = vmatpush.bf16.msra.mxu3 %v429_v7 }
  0x21   :  { %189 = vmatmul.bf16.vlgmr.msra.gmra.mxu0 %v421_v8  ;;  %199 = vmatmul.bf16.vlgmr.msra.gmra.mxu1 %v423_v9 }
  0x22   :  { %209 = vmatmul.bf16.vlgmr.msra.gmra.mxu2 %v425_v10  ;;  %219 = vmatmul.bf16.vlgmr.msra.gmra.mxu3 %v427_v11 }
  0x31   :  { %194 = vmatmul.bf16.gmra.mxu0 %v422_v12  ;;  %204 = vmatmul.bf16.gmra.mxu1 %v424_v13 }
  0x32   :  { %214 = vmatmul.bf16.gmra.mxu2 %v426_v14  ;;  %224 = vmatmul.bf16.gmra.mxu3 %v428_v15 }
  0x9e   :  { %v190_v18 = vpop.f32.mrf.mxu0  ;;  %v200_v19 = vpop.f32.mrf.mxu1 }
  0x9f   :  { %v285_v20 = vmul.f32 %v539_v16, %v190_v18  ;;  %v289_v21 = vmul.f32 %v539_v16, %v200_v19 }
  0xa1   :  { %v305_v22 = vadd.f32 %v544_v17, %v285_v20  ;;  %v309_v23 = vadd.f32 %v544_v17, %v289_v21 }
  0xa3   :  { %v321_v24 = vmax.f32 %v305_v22, 0.0  ;;  %v325_v25 = vmax.f32 %v309_v23, 0.0 }
  0xa5   :  { %337 = vst [vmem:[%s630_s4] sm:$0xff] %v321_v24  ;;  %v210_v26 = vpop.f32.mrf.mxu2  ;;  %v220_v27 = vpop.f32.mrf.mxu3 }
  0xa6   :  { %341 = vst [vmem:[%s630_s4 + $0x20] sm:$0xff] %v325_v25  ;;  %v293_v28 = vmul.f32 %v539_v16, %v210_v26  ;;  %v297_v29 = vmul.f32 %v539_v16, %v220_v27  ;;  %v192_v30 = vpop.f32.mrf.mxu0  ;;  %v202_v31 = vpop.f32.mrf.mxu1 }
  0xa7   :  { %v286_v32 = vmul.f32 %v539_v16, %v192_v30  ;;  %v290_v33 = vmul.f32 %v539_v16, %v202_v31 }
  0xa8   :  { %v313_v34 = vadd.f32 %v544_v17, %v293_v28  ;;  %v317_v35 = vadd.f32 %v544_v17, %v297_v29 }
  0xa9   :  { %v306_v36 = vadd.f32 %v544_v17, %v286_v32  ;;  %v310_v37 = vadd.f32 %v544_v17, %v290_v33 }
  0xaa   :  { %v329_v38 = vmax.f32 %v313_v34, 0.0  ;;  %v333_v39 = vmax.f32 %v317_v35, 0.0 }
  0xab   :  { %v322_v40 = vmax.f32 %v306_v36, 0.0  ;;  %v326_v41 = vmax.f32 %v310_v37, 0.0 }
  0xac   :  { %345 = vst [vmem:[%s630_s4 + $0x40] sm:$0xff] %v329_v38 }
  0xad   :  { %349 = vst [vmem:[%s630_s4 + $0x60] sm:$0xff] %v333_v39  ;;  %v212_v42 = vpop.f32.mrf.mxu2  ;;  %v222_v43 = vpop.f32.mrf.mxu3 }
  0xae   :  { %338 = vst [vmem:[%s630_s4 + $0x8] sm:$0xff] %v322_v40  ;;  %v294_v44 = vmul.f32 %v539_v16, %v212_v42  ;;  %v298_v45 = vmul.f32 %v539_v16, %v222_v43  ;;  %v195_v46 = vpop.f32.mrf.mxu0  ;;  %v205_v47 = vpop.f32.mrf.mxu1 }
  0xaf   :  { %342 = vst [vmem:[%s630_s4 + $0x28] sm:$0xff] %v326_v41  ;;  %v287_v48 = vmul.f32 %v539_v16, %v195_v46  ;;  %v291_v49 = vmul.f32 %v539_v16, %v205_v47 }
  0xb0   :  { %v314_v50 = vadd.f32 %v544_v17, %v294_v44  ;;  %v318_v51 = vadd.f32 %v544_v17, %v298_v45 }
  0xb1   :  { %v307_v52 = vadd.f32 %v544_v17, %v287_v48  ;;  %v311_v53 = vadd.f32 %v544_v17, %v291_v49 }
  0xb2   :  { %v330_v54 = vmax.f32 %v314_v50, 0.0  ;;  %v334_v55 = vmax.f32 %v318_v51, 0.0 }
  0xb3   :  { %v323_v56 = vmax.f32 %v307_v52, 0.0  ;;  %v327_v57 = vmax.f32 %v311_v53, 0.0 }
  0xb4   :  { %346 = vst [vmem:[%s630_s4 + $0x48] sm:$0xff] %v330_v54 }
  0xb5   :  { %350 = vst [vmem:[%s630_s4 + $0x68] sm:$0xff] %v334_v55  ;;  %v215_v58 = vpop.f32.mrf.mxu2  ;;  %v225_v59 = vpop.f32.mrf.mxu3 }
  0xb6   :  { %339 = vst [vmem:[%s630_s4 + $0x10] sm:$0xff] %v323_v56  ;;  %v295_v60 = vmul.f32 %v539_v16, %v215_v58  ;;  %v299_v61 = vmul.f32 %v539_v16, %v225_v59  ;;  %v197_v62 = vpop.f32.mrf.mxu0  ;;  %v207_v63 = vpop.f32.mrf.mxu1 }
  0xb7   :  { %343 = vst [vmem:[%s630_s4 + $0x30] sm:$0xff] %v327_v57  ;;  %v288_v0 = vmul.f32 %v539_v16, %v197_v62  ;;  %v292_v1 = vmul.f32 %v539_v16, %v207_v63 }
  0xb8   :  { %v315_v2 = vadd.f32 %v544_v17, %v295_v60  ;;  %v319_v3 = vadd.f32 %v544_v17, %v299_v61 }
  0xb9   :  { %v308_v4 = vadd.f32 %v544_v17, %v288_v0  ;;  %v312_v5 = vadd.f32 %v544_v17, %v292_v1 }
  0xba   :  { %v331_v6 = vmax.f32 %v315_v2, 0.0  ;;  %v335_v7 = vmax.f32 %v319_v3, 0.0 }
  0xbb   :  { %v324_v8 = vmax.f32 %v308_v4, 0.0  ;;  %v328_v9 = vmax.f32 %v312_v5, 0.0 }
  0xbc   :  { %347 = vst [vmem:[%s630_s4 + $0x50] sm:$0xff] %v331_v6 }
  0xbd   :  { %351 = vst [vmem:[%s630_s4 + $0x70] sm:$0xff] %v335_v7  ;;  %v217_v10 = vpop.f32.mrf.mxu2  ;;  %v227_v11 = vpop.f32.mrf.mxu3 }
  0xbe   :  { %340 = vst [vmem:[%s630_s4 + $0x18] sm:$0xff] %v324_v8  ;;  %v296_v12 = vmul.f32 %v539_v16, %v217_v10  ;;  %v300_v13 = vmul.f32 %v539_v16, %v227_v11 }
  0xbf   :  { %344 = vst [vmem:[%s630_s4 + $0x38] sm:$0xff] %v328_v9 }
  0xc0   :  { %v316_v14 = vadd.f32 %v544_v17, %v296_v12  ;;  %v320_v15 = vadd.f32 %v544_v17, %v300_v13 }
  0xc2   :  { %v332_v18 = vmax.f32 %v316_v14, 0.0  ;;  %v336_v19 = vmax.f32 %v320_v15, 0.0 }
  0xc4   :  { %348 = vst [vmem:[%s630_s4 + $0x58] sm:$0xff] %v332_v18 }
  0xc5   :  { %352 = vst [vmem:[%s630_s4 + $0x78] sm:$0xff] %v336_v19 }

// kernel: network_block_forward.11
= control target key start
LH: loop header
LB: loop body
LE: loop exit
PB: predicated region body
PF: predicated region fallthrough
CT: control target
= control target key end

     0   :  { %vm86_vm0 = vcmask 64512   ;;  %s265_s0 = inlined_call_operand.vmem [shape: f32[128,8], index: 0, kind: input, shape index: {}]   ;;  %s266_s1 = inlined_call_operand.vmem [shape: f32[1,8], index: 1, kind: input, shape index: {}]   ;;  %s267_s2 = inlined_call_operand.vmem [shape: f32[1,8], index: 2, kind: input, shape index: {}]   ;;  %s268_s3 = inlined_call_operand.vmem [shape: f32[128,8], index: 3, kind: output, shape index: {}]  }
   0x1   :  { %v14_v0 = vld [vmem:[%s265_s0] sm:$0xff]  ;;  %v15_v3 = vld [vmem:[%s265_s0 + $0x8] sm:$0xff]  ;;  %v16_v6 = vld [vmem:[%s265_s0 + $0x10] sm:$0xff] }
   0x2   :  { %v107_v1 = vld [vmem:[%s266_s1] ss:$0 sm:$0xff]  ;;  %v17_v7 = vld [vmem:[%s265_s0 + $0x18] sm:$0xff]  ;;  %v19_v12 = vld [vmem:[%s265_s0 + $0x28] sm:$0xff] }
   0x3   :  { %v138_v2 = vld [vmem:[%s267_s2] ss:$0 sm:$0xff]  ;;  %v34_v4 = vmul.f32 %v107_v1, %v14_v0  ;;  %v35_v5 = vmul.f32 %v107_v1, %v15_v3  ;;  %v36_v9 = vmul.f32 %v107_v1, %v16_v6  ;;  %v37_v10 = vmul.f32 %v107_v1, %v17_v7  ;;  %v20_v13 = vld [vmem:[%s265_s0 + $0x30] sm:$0xff]  ;;  %v21_v14 = vld [vmem:[%s265_s0 + $0x38] sm:$0xff] }
   0x4   :  { %v18_v8 = vld [vmem:[%s265_s0 + $0x20] sm:$0xff]  ;;  %v39_v17 = vmul.f32 %v107_v1, %v19_v12  ;;  %v40_v18 = vmul.f32 %v107_v1, %v20_v13  ;;  %v41_v22 = vmul.f32 %v107_v1, %v21_v14  ;;  %v23_v24 = vld [vmem:[%s265_s0 + $0x48] sm:$0xff]  ;;  %v24_v29 = vld [vmem:[%s265_s0 + $0x50] sm:$0xff] }
   0x5   :  { %v38_v11 = vmul.f32 %v107_v1, %v18_v8  ;;  %v54_v15 = vadd.f32 %v138_v2, %v34_v4  ;;  %v55_v16 = vadd.f32 %v138_v2, %v35_v5  ;;  %v56_v19 = vadd.f32 %v138_v2, %v36_v9  ;;  %v22_v23 = vld [vmem:[%s265_s0 + $0x40] sm:$0xff]  ;;  %v25_v30 = vld [vmem:[%s265_s0 + $0x58] sm:$0xff]  ;;  %v27_v35 = vld [vmem:[%s265_s0 + $0x68] sm:$0xff] }
   0x6   :  { %v57_v20 = vadd.f32 %v138_v2, %v37_v10  ;;  %v59_v27 = vadd.f32 %v138_v2, %v39_v17  ;;  %v60_v28 = vadd.f32 %v138_v2, %v40_v18  ;;  %v26_v31 = vld [vmem:[%s265_s0 + $0x60] sm:$0xff]  ;;  %v61_v34 = vadd.f32 %v138_v2, %v41_v22  ;;  %v28_v36 = vld [vmem:[%s265_s0 + $0x70] sm:$0xff]  ;;  %v29_v41 = vld [vmem:[%s265_s0 + $0x78] sm:$0xff] }
   0x7   :  { %v58_v21 = vadd.f32 %v138_v2, %v38_v11  ;;  %v70_v25 = vmax.f32 %v54_v15, 0.0  ;;  %v71_v26 = vmax.f32 %v55_v16, 0.0  ;;  %v72_v32 = vmax.f32 %v56_v19, 0.0 }
   0x8   :  { %v73_v33 = vmax.f32 %v57_v20, 0.0  ;;  %v75_v38 = vmax.f32 %v59_v27, 0.0  ;;  %v42_v39 = vmul.f32 %v107_v1, %v22_v23  ;;  %v43_v40 = vmul.f32 %v107_v1, %v23_v24 }
   0x9   :  { %87 = vst.msk [vmem:[%s268_s3] sm:$0xff] %vm86_vm0, %v70_v25  ;;  %v74_v37 = vmax.f32 %v58_v21, 0.0  ;;  %v76_v42 = vmax.f32 %v60_v28, 0.0  ;;  %v44_v43 = vmul.f32 %v107_v1, %v24_v29  ;;  %v45_v44 = vmul.f32 %v107_v1, %v25_v30 }
   0xa   :  { %88 = vst.msk [vmem:[%s268_s3 + $0x8] sm:$0xff] %vm86_vm0, %v71_v26  ;;  %v46_v45 = vmul.f32 %v107_v1, %v26_v31  ;;  %v62_v46 = vadd.f32 %v138_v2, %v42_v39  ;;  %v63_v47 = vadd.f32 %v138_v2, %v43_v40  ;;  %v47_v48 = vmul.f32 %v107_v1, %v27_v35 }
   0xb   :  { %89 = vst.msk [vmem:[%s268_s3 + $0x10] sm:$0xff] %vm86_vm0, %v72_v32  ;;  %v48_v49 = vmul.f32 %v107_v1, %v28_v36  ;;  %v77_v50 = vmax.f32 %v61_v34, 0.0  ;;  %v64_v51 = vadd.f32 %v138_v2, %v44_v43  ;;  %v65_v52 = vadd.f32 %v138_v2, %v45_v44 }
   0xc   :  { %90 = vst.msk [vmem:[%s268_s3 + $0x18] sm:$0xff] %vm86_vm0, %v73_v33  ;;  %v49_v53 = vmul.f32 %v107_v1, %v29_v41  ;;  %v78_v54 = vmax.f32 %v62_v46, 0.0  ;;  %v66_v55 = vadd.f32 %v138_v2, %v46_v45  ;;  %v79_v56 = vmax.f32 %v63_v47, 0.0 }
   0xd   :  { %91 = vst.msk [vmem:[%s268_s3 + $0x20] sm:$0xff] %vm86_vm0, %v74_v37  ;;  %v67_v57 = vadd.f32 %v138_v2, %v47_v48  ;;  %v80_v58 = vmax.f32 %v64_v51, 0.0  ;;  %v68_v59 = vadd.f32 %v138_v2, %v48_v49  ;;  %v81_v60 = vmax.f32 %v65_v52, 0.0 }
   0xe   :  { %92 = vst.msk [vmem:[%s268_s3 + $0x28] sm:$0xff] %vm86_vm0, %v75_v38  ;;  %v69_v61 = vadd.f32 %v138_v2, %v49_v53  ;;  %v82_v62 = vmax.f32 %v66_v55, 0.0 }
   0xf   :  { %93 = vst.msk [vmem:[%s268_s3 + $0x30] sm:$0xff] %vm86_vm0, %v76_v42  ;;  %v83_v63 = vmax.f32 %v67_v57, 0.0  ;;  %v84_v0 = vmax.f32 %v68_v59, 0.0 }
  0x10   :  { %94 = vst.msk [vmem:[%s268_s3 + $0x38] sm:$0xff] %vm86_vm0, %v77_v50  ;;  %v85_v1 = vmax.f32 %v69_v61, 0.0 }
  0x11   :  { %95 = vst.msk [vmem:[%s268_s3 + $0x40] sm:$0xff] %vm86_vm0, %v78_v54 }
  0x12   :  { %96 = vst.msk [vmem:[%s268_s3 + $0x48] sm:$0xff] %vm86_vm0, %v79_v56 }
  0x13   :  { %97 = vst.msk [vmem:[%s268_s3 + $0x50] sm:$0xff] %vm86_vm0, %v80_v58 }
  0x14   :  { %98 = vst.msk [vmem:[%s268_s3 + $0x58] sm:$0xff] %vm86_vm0, %v81_v60 }
  0x15   :  { %99 = vst.msk [vmem:[%s268_s3 + $0x60] sm:$0xff] %vm86_vm0, %v82_v62 }
  0x16   :  { %100 = vst.msk [vmem:[%s268_s3 + $0x68] sm:$0xff] %vm86_vm0, %v83_v63 }
  0x17   :  { %101 = vst.msk [vmem:[%s268_s3 + $0x70] sm:$0xff] %vm86_vm0, %v84_v0 }
  0x18   :  { %102 = vst.msk [vmem:[%s268_s3 + $0x78] sm:$0xff] %vm86_vm0, %v85_v1 }

// kernel: network_block_forward.10
= control target key start
LH: loop header
LB: loop body
LE: loop exit
PB: predicated region body
PF: predicated region fallthrough
CT: control target
= control target key end

     0   :  { %s598_s1 = inlined_call_operand.vmem [shape: bf16[128,128], index: 1, kind: input, shape index: {}]   ;;  %s599_s0 = inlined_call_operand.vmem [shape: bf16[128,128], index: 0, kind: input, shape index: {}]   ;;  %s600_s2 = inlined_call_operand.vmem [shape: f32[128,128], index: 2, kind: input, shape index: {}]   ;;  %s601_s3 = inlined_call_operand.vmem [shape: f32[128,128], index: 3, kind: output, shape index: {}]  }
   0x1   :  { %v409_v0 = vld [vmem:[%s598_s1 + $0x38] sm:$0xff]  ;;  %v408_v1 = vld [vmem:[%s598_s1 + $0x30] sm:$0xff]  ;;  %v407_v2 = vld [vmem:[%s598_s1 + $0x28] sm:$0xff] }
   0x2   :  { %178 = vmatpush.bf16.msra.mxu0 %v409_v0  ;;  %410 = vmatpush.bf16.msra.mxu1 %v409_v0  ;;  %v406_v3 = vld [vmem:[%s598_s1 + $0x20] sm:$0xff]  ;;  %v405_v4 = vld [vmem:[%s598_s1 + $0x18] sm:$0xff]  ;;  %v404_v5 = vld [vmem:[%s598_s1 + $0x10] sm:$0xff] }
   0x3   :  { %411 = vmatpush.bf16.msra.mxu2 %v409_v0  ;;  %412 = vmatpush.bf16.msra.mxu3 %v409_v0  ;;  %v403_v6 = vld [vmem:[%s598_s1 + $0x8] sm:$0xff]  ;;  %v402_v7 = vld [vmem:[%s598_s1] sm:$0xff]  ;;  %v396_v9 = vld [vmem:[%s599_s0 + $0x10] sm:$0xff] }
   0x4   :  { %v394_v8 = vld [vmem:[%s599_s0] sm:$0xff]  ;;  %v400_v11 = vld [vmem:[%s599_s0 + $0x30] sm:$0xff]  ;;  %v395_v12 = vld [vmem:[%s599_s0 + $0x8] sm:$0xff] }
   0x5   :  { %v398_v10 = vld [vmem:[%s599_s0 + $0x20] sm:$0xff]  ;;  %v397_v13 = vld [vmem:[%s599_s0 + $0x18] sm:$0xff]  ;;  %v399_v14 = vld [vmem:[%s599_s0 + $0x28] sm:$0xff] }
   0x6   :  { %179 = vmatpush.bf16.msra.mxu0 %v408_v1  ;;  %413 = vmatpush.bf16.msra.mxu1 %v408_v1  ;;  %v401_v15 = vld [vmem:[%s599_s0 + $0x38] sm:$0xff]  ;;  %v278_v16 = vld [vmem:[%s600_s2] sm:$0xff]  ;;  %v279_v24 = vld [vmem:[%s600_s2 + $0x8] sm:$0xff] }
   0x7   :  { %414 = vmatpush.bf16.msra.mxu2 %v408_v1  ;;  %415 = vmatpush.bf16.msra.mxu3 %v408_v1  ;;  %v282_v17 = vld [vmem:[%s600_s2 + $0x20] sm:$0xff]  ;;  %v283_v25 = vld [vmem:[%s600_s2 + $0x28] sm:$0xff]  ;;  %v280_v36 = vld [vmem:[%s600_s2 + $0x10] sm:$0xff] }
   0x8   :  { %v286_v22 = vld [vmem:[%s600_s2 + $0x40] sm:$0xff]  ;;  %v287_v34 = vld [vmem:[%s600_s2 + $0x48] sm:$0xff]  ;;  %v284_v37 = vld [vmem:[%s600_s2 + $0x30] sm:$0xff] }
   0x9   :  { %v290_v23 = vld [vmem:[%s600_s2 + $0x60] sm:$0xff]  ;;  %v291_v35 = vld [vmem:[%s600_s2 + $0x68] sm:$0xff]  ;;  %v288_v46 = vld [vmem:[%s600_s2 + $0x50] sm:$0xff] }
   0xa   :  { %180 = vmatpush.bf16.msra.mxu0 %v407_v2  ;;  %416 = vmatpush.bf16.msra.mxu1 %v407_v2  ;;  %v292_v47 = vld [vmem:[%s600_s2 + $0x70] sm:$0xff]  ;;  %v281_v48 = vld [vmem:[%s600_s2 + $0x18] sm:$0xff] }
   0xb   :  { %417 = vmatpush.bf16.msra.mxu2 %v407_v2  ;;  %418 = vmatpush.bf16.msra.mxu3 %v407_v2  ;;  %v285_v49 = vld [vmem:[%s600_s2 + $0x38] sm:$0xff] }
   0xc   :  { %v289_v58 = vld [vmem:[%s600_s2 + $0x58] sm:$0xff] }
   0xd   :  { %v293_v59 = vld [vmem:[%s600_s2 + $0x78] sm:$0xff] }
   0xe   :  { %181 = vmatpush.bf16.msra.mxu0 %v406_v3  ;;  %419 = vmatpush.bf16.msra.mxu1 %v406_v3 }
   0xf   :  { %420 = vmatpush.bf16.msra.mxu2 %v406_v3  ;;  %421 = vmatpush.bf16.msra.mxu3 %v406_v3 }
  0x12   :  { %182 = vmatpush.bf16.msra.mxu0 %v405_v4  ;;  %422 = vmatpush.bf16.msra.mxu1 %v405_v4 }
  0x13   :  { %423 = vmatpush.bf16.msra.mxu2 %v405_v4  ;;  %424 = vmatpush.bf16.msra.mxu3 %v405_v4 }
  0x16   :  { %183 = vmatpush.bf16.msra.mxu0 %v404_v5  ;;  %425 = vmatpush.bf16.msra.mxu1 %v404_v5 }
  0x17   :  { %426 = vmatpush.bf16.msra.mxu2 %v404_v5  ;;  %427 = vmatpush.bf16.msra.mxu3 %v404_v5 }
  0x1a   :  { %184 = vmatpush.bf16.msra.mxu0 %v403_v6  ;;  %428 = vmatpush.bf16.msra.mxu1 %v403_v6 }
  0x1b   :  { %429 = vmatpush.bf16.msra.mxu2 %v403_v6  ;;  %430 = vmatpush.bf16.msra.mxu3 %v403_v6 }
  0x1e   :  { %185 = vmatpush.bf16.msra.mxu0 %v402_v7  ;;  %431 = vmatpush.bf16.msra.mxu1 %v402_v7 }
  0x1f   :  { %432 = vmatpush.bf16.msra.mxu2 %v402_v7  ;;  %433 = vmatpush.bf16.msra.mxu3 %v402_v7 }
  0x21   :  { %186 = vmatmul.bf16.vlgmr.msra.gmra.mxu0 %v394_v8  ;;  %196 = vmatmul.bf16.vlgmr.msra.gmra.mxu1 %v396_v9 }
  0x22   :  { %206 = vmatmul.bf16.vlgmr.msra.gmra.mxu2 %v398_v10  ;;  %216 = vmatmul.bf16.vlgmr.msra.gmra.mxu3 %v400_v11 }
  0x31   :  { %191 = vmatmul.bf16.gmra.mxu0 %v395_v12  ;;  %201 = vmatmul.bf16.gmra.mxu1 %v397_v13 }
  0x32   :  { %211 = vmatmul.bf16.gmra.mxu2 %v399_v14  ;;  %221 = vmatmul.bf16.gmra.mxu3 %v401_v15 }
  0x9e   :  { %v187_v18 = vpop.f32.mrf.mxu0  ;;  %v197_v19 = vpop.f32.mrf.mxu1 }
  0x9f   :  { %v294_v20 = vadd.f32 %v278_v16, %v187_v18  ;;  %v298_v21 = vadd.f32 %v282_v17, %v197_v19 }
  0xa1   :  { %310 = vst [vmem:[%s601_s3] sm:$0xff] %v294_v20 }
  0xa2   :  { %314 = vst [vmem:[%s601_s3 + $0x20] sm:$0xff] %v298_v21 }
  0xa5   :  { %v207_v26 = vpop.f32.mrf.mxu2  ;;  %v217_v27 = vpop.f32.mrf.mxu3 }
  0xa6   :  { %v302_v28 = vadd.f32 %v286_v22, %v207_v26  ;;  %v306_v29 = vadd.f32 %v290_v23, %v217_v27  ;;  %v189_v30 = vpop.f32.mrf.mxu0  ;;  %v199_v31 = vpop.f32.mrf.mxu1 }
  0xa7   :  { %v295_v32 = vadd.f32 %v279_v24, %v189_v30  ;;  %v299_v33 = vadd.f32 %v283_v25, %v199_v31 }
  0xa8   :  { %318 = vst [vmem:[%s601_s3 + $0x40] sm:$0xff] %v302_v28 }
  0xa9   :  { %322 = vst [vmem:[%s601_s3 + $0x60] sm:$0xff] %v306_v29 }
  0xaa   :  { %311 = vst [vmem:[%s601_s3 + $0x8] sm:$0xff] %v295_v32 }
  0xab   :  { %315 = vst [vmem:[%s601_s3 + $0x28] sm:$0xff] %v299_v33 }
  0xad   :  { %v209_v38 = vpop.f32.mrf.mxu2  ;;  %v219_v39 = vpop.f32.mrf.mxu3 }
  0xae   :  { %v303_v40 = vadd.f32 %v287_v34, %v209_v38  ;;  %v307_v41 = vadd.f32 %v291_v35, %v219_v39  ;;  %v192_v42 = vpop.f32.mrf.mxu0  ;;  %v202_v43 = vpop.f32.mrf.mxu1 }
  0xaf   :  { %v296_v44 = vadd.f32 %v280_v36, %v192_v42  ;;  %v300_v45 = vadd.f32 %v284_v37, %v202_v43 }
  0xb0   :  { %319 = vst [vmem:[%s601_s3 + $0x48] sm:$0xff] %v303_v40 }
  0xb1   :  { %323 = vst [vmem:[%s601_s3 + $0x68] sm:$0xff] %v307_v41 }
  0xb2   :  { %312 = vst [vmem:[%s601_s3 + $0x10] sm:$0xff] %v296_v44 }
  0xb3   :  { %316 = vst [vmem:[%s601_s3 + $0x30] sm:$0xff] %v300_v45 }
  0xb5   :  { %v212_v50 = vpop.f32.mrf.mxu2  ;;  %v222_v51 = vpop.f32.mrf.mxu3 }
  0xb6   :  { %v304_v52 = vadd.f32 %v288_v46, %v212_v50  ;;  %v308_v53 = vadd.f32 %v292_v47, %v222_v51  ;;  %v194_v54 = vpop.f32.mrf.mxu0  ;;  %v204_v55 = vpop.f32.mrf.mxu1 }
  0xb7   :  { %v297_v56 = vadd.f32 %v281_v48, %v194_v54  ;;  %v301_v57 = vadd.f32 %v285_v49, %v204_v55 }
  0xb8   :  { %320 = vst [vmem:[%s601_s3 + $0x50] sm:$0xff] %v304_v52 }
  0xb9   :  { %324 = vst [vmem:[%s601_s3 + $0x70] sm:$0xff] %v308_v53 }
  0xba   :  { %313 = vst [vmem:[%s601_s3 + $0x18] sm:$0xff] %v297_v56 }
  0xbb   :  { %317 = vst [vmem:[%s601_s3 + $0x38] sm:$0xff] %v301_v57 }
  0xbd   :  { %v214_v60 = vpop.f32.mrf.mxu2  ;;  %v224_v61 = vpop.f32.mrf.mxu3 }
  0xbe   :  { %v305_v62 = vadd.f32 %v289_v58, %v214_v60  ;;  %v309_v63 = vadd.f32 %v293_v59, %v224_v61 }
  0xc0   :  { %321 = vst [vmem:[%s601_s3 + $0x58] sm:$0xff] %v305_v62 }
  0xc1   :  { %325 = vst [vmem:[%s601_s3 + $0x78] sm:$0xff] %v309_v63 }

</bundles_post_ra>
